<compile_context>
chip_gen: v6e
topology: v6e:2x2x1
jax: 0.10.0
libtpu: 0.0.40
codegen_flags: <defaults>
</compile_context>

<pallas_src>
import math

import jax
import jax.numpy as jnp
from jax.experimental import pallas as pl
from jax.experimental.pallas import tpu as pltpu

SUB, LANE = 8, 128  # one vreg tile = 8 x 128 rays


# ----------------------------------------------------------------------------- glue
def sixD_to_mtx(r):
    """6D rotation rep -> rotation matrix.  r: (N, 3, 2) -> (N, 3, 3)."""
    b1 = r[..., 0]
    b1 = b1 / jnp.linalg.norm(b1, axis=-1, keepdims=True)
    b2 = r[..., 1] - jnp.sum(b1 * r[..., 1], axis=-1, keepdims=True) * b1
    b2 = b2 / jnp.linalg.norm(b2, axis=-1, keepdims=True)
    b3 = jnp.cross(b1, b2)
    return jnp.stack([b1, b2, b3], axis=-1)


def _prepare(params, view_ids, W, H, is_train):
    """Parameter setup shared by the Pallas path and the pure-JAX reference."""
    V = view_ids.shape[0]
    R = params["world2rf"].shape[0]

    # self.focal(W) / self.center(W, H)
    focal = params["init_focal"][0] * params["focal_offset"][0] * W / params["W0"]
    center = jnp.array([W, H], jnp.float32) * params["center_rel"]

    # get_cam2world(view_ids): (V, 3, 4)
    r_sel = params["r_c2w"][view_ids]
    t_sel = params["t_c2w"][view_ids]
    cam2world = jnp.concatenate([sixD_to_mtx(r_sel), t_sel[..., None]], axis=-1)

    # cam2rf[rf]: translation column shifted by world2rf[rf] -> (R, V, 3, 4)
    cam2rf = jnp.broadcast_to(cam2world[None], (R, V, 3, 4))
    cam2rf = cam2rf.at[:, :, :, 3].add(params["world2rf"][:, None, :])

    blend = params["blending_weights"][view_ids]  # (V, R)
    if is_train:
        # blending_weights[:, -1] = 1 ; blending_weights[:, :-1] = 0
        blend = jnp.zeros_like(blend).at[:, -1].set(1.0)

    exposure = params["exposure"][view_ids]  # (V, 3, 3)
    return focal, center, cam2rf, blend, exposure


def planar_to_flat(x):
    """(V, C, rows, 128) -> (V*rows*128, C).  Test-only glue; downstream
    consumers should use the planar layout directly."""
    return x.transpose(0, 2, 3, 1).reshape(-1, x.shape[1])


# ----------------------------------------------------------------------------- kernel
def _make_kernel(W, H, R_act):
    inv_w = 1.0 / float(W)
    inv_h = 1.0 / float(H)

    def kernel(ray_ids_ref, rgb_rf_ref, depth_rf_ref,
               cam2rf_ref, expo_ref, blend_ref, intr_ref,
               rgbs_ref, depth_ref, dirs_ref, ij_ref, rays_ref):
        v = pl.program_id(0)
        ids = ray_ids_ref[0]  # (BR, 128) int32

        # ids2pixel: col = ids % W ; row = (ids // W) % H.
        # Vector floor-div via f32 reciprocal-multiply + exact int32 correction
        # (exact for ids < 2**24; asserted in the wrapper).
        def floordiv(x_i32, d, inv_d):
            q = jnp.floor(x_i32.astype(jnp.float32) * inv_d).astype(jnp.int32)
            r = x_i32 - q * d
            q = jnp.where(r < 0, q - 1, q)
            q = jnp.where(r >= d, q + 1, q)
            return q

        q_w = floordiv(ids, W, inv_w)
        col = ids - q_w * W
        q_h = floordiv(q_w, H, inv_h)
        row = q_w - q_h * H

        inv_focal = intr_ref[0]
        cx = intr_ref[1]
        cy = intr_ref[2]

        # get_ray_directions_lean: [(i - cx)/f, (j - cy)/f, 1]
        dx = (col.astype(jnp.float32) - cx) * inv_focal
        dy = (row.astype(jnp.float32) - cy) * inv_focal

        dirs_ref[0, 0] = dx
        dirs_ref[0, 1] = dy
        dirs_ref[0, 2] = jnp.ones_like(dx)
        ij_ref[0, 0] = col
        ij_ref[0, 1] = row

        # blending accumulation over the active RFs only
        # (is_train: just the last RF; zero-weight RFs are never DMA'd).
        acc_r = jnp.zeros_like(dx)
        acc_g = jnp.zeros_like(dx)
        acc_b = jnp.zeros_like(dx)
        acc_d = jnp.zeros_like(dx)
        for rf in range(R_act):  # static unroll
            w = blend_ref[v, rf]
            acc_r = acc_r + w * rgb_rf_ref[rf, 0, 0]
            acc_g = acc_g + w * rgb_rf_ref[rf, 0, 1]
            acc_b = acc_b + w * rgb_rf_ref[rf, 0, 2]
            acc_d = acc_d + w * depth_rf_ref[rf, 0]

        # get_rays_lean for the training-active (last) RF: rays = [o | R @ dir]
        c = [cam2rf_ref[v, k] for k in range(12)]  # 3x4 row-major of last RF
        zero = jnp.zeros_like(dx)
        rays_ref[0, 0] = zero + c[3]
        rays_ref[0, 1] = zero + c[7]
        rays_ref[0, 2] = zero + c[11]
        rays_ref[0, 3] = c[0] * dx + c[1] * dy + c[2]   # dz == 1
        rays_ref[0, 4] = c[4] * dx + c[5] * dy + c[6]
        rays_ref[0, 5] = c[8] * dx + c[9] * dy + c[10]

        # exposure: rgb <- E(view) @ rgb ; then clamp(0, 1)
        e = [expo_ref[v, k] for k in range(9)]
        rgbs_ref[0, 0] = jnp.clip(e[0] * acc_r + e[1] * acc_g + e[2] * acc_b, 0.0, 1.0)
        rgbs_ref[0, 1] = jnp.clip(e[3] * acc_r + e[4] * acc_g + e[5] * acc_b, 0.0, 1.0)
        rgbs_ref[0, 2] = jnp.clip(e[6] * acc_r + e[7] * acc_g + e[8] * acc_b, 0.0, 1.0)
        depth_ref[0] = acc_d

    return kernel


def _pick_block_rows(rows, r_act, cap=512):
    """Largest divisor of `rows` that is a multiple of 8, capped so that the
    double-buffered working set ((1 + 4*R_act) input + 15 output f32 planes)
    stays under ~24 MiB (fits v5e's 16->32 MiB raised scoped VMEM and v7x's
    64 MiB physical)."""
    assert rows % SUB == 0
    planes = 16 + 4 * r_act
    budget_rows = (24 * 1024 * 1024) // (2 * planes * LANE * 4)
    cap = max(SUB, min(cap, (budget_rows // SUB) * SUB))
    best = SUB
    for br in range(SUB, min(rows, cap) + 1, SUB):
        if rows % br == 0:
            best = br
    return best


def _call_kernel(ray_ids_p, rgb_rf_p, depth_rf_p, cam2rf_last, expo_flat,
                 blend_act, intr, W, H, rf_block, R_act, block_rows):
    V, rows, _ = ray_ids_p.shape
    grid = (V, rows // block_rows)
    kernel = _make_kernel(W, H, R_act)

    out_shape = (
        jax.ShapeDtypeStruct((V, 3, rows, LANE), jnp.float32),  # rgbs
        jax.ShapeDtypeStruct((V, rows, LANE), jnp.float32),     # depth_maps
        jax.ShapeDtypeStruct((V, 3, rows, LANE), jnp.float32),  # directions
        jax.ShapeDtypeStruct((V, 2, rows, LANE), jnp.int32),    # ij
        jax.ShapeDtypeStruct((V, 6, rows, LANE), jnp.float32),  # rays (o|d), last RF
    )
    in_specs = [
        pl.BlockSpec((1, block_rows, LANE), lambda v, t: (v, t, 0)),      # ray_ids
        # only the active RF range is DMA'd (rf_block selects the last RF in
        # train mode; no wrapper-side slicing copy needed)
        pl.BlockSpec((R_act, 1, 3, block_rows, LANE),
                     lambda v, t: (rf_block, v, 0, t, 0)),                # rgb_rf
        pl.BlockSpec((R_act, 1, block_rows, LANE),
                     lambda v, t: (rf_block, v, t, 0)),                   # depth_rf
        pl.BlockSpec(memory_space=pltpu.MemorySpace.SMEM),                # cam2rf_last (V,12)
        pl.BlockSpec(memory_space=pltpu.MemorySpace.SMEM),                # exposure (V,9)
        pl.BlockSpec(memory_space=pltpu.MemorySpace.SMEM),                # blend (V,R_act)
        pl.BlockSpec(memory_space=pltpu.MemorySpace.SMEM),                # intr (3,)
    ]
    out_specs = (
        pl.BlockSpec((1, 3, block_rows, LANE), lambda v, t: (v, 0, t, 0)),
        pl.BlockSpec((1, block_rows, LANE), lambda v, t: (v, t, 0)),
        pl.BlockSpec((1, 3, block_rows, LANE), lambda v, t: (v, 0, t, 0)),
        pl.BlockSpec((1, 2, block_rows, LANE), lambda v, t: (v, 0, t, 0)),
        pl.BlockSpec((1, 6, block_rows, LANE), lambda v, t: (v, 0, t, 0)),
    )
    fn = pl.pallas_call(
        kernel,
        out_shape=out_shape,
        grid=grid,
        in_specs=in_specs,
        out_specs=out_specs,
        compiler_params=pltpu.CompilerParams(
            dimension_semantics=("parallel", "parallel"),
            vmem_limit_bytes=32 * 1024 * 1024),
    )
    return fn(ray_ids_p, rgb_rf_p, depth_rf_p, cam2rf_last, expo_flat, blend_act, intr)


# ----------------------------------------------------------------------------- forward
def local_tensorfs_forward(params, ray_ids, view_ids, W, H,
                           rgb_rf_planar, depth_rf_planar, is_train=True):
    """LocalTensorfs.forward with the per-ray math in Pallas.

    rgb_rf_planar (R, V, 3, rows, 128) / depth_rf_planar (R, V, rows, 128) are
    the per-RF TensorVMSplit renderer outputs in the canonical planar layout.
    Returns planar outputs (rgbs, depth, dirs, ij, rays); use planar_to_flat to
    recover the PyTorch (N, C) layout when needed.
    """
    V = view_ids.shape[0]
    N = ray_ids.shape[0]
    R = rgb_rf_planar.shape[0]
    assert N % V == 0, "ray_ids must be view-major with equal rays per view"
    rpv = N // V
    assert rpv % (SUB * LANE) == 0, "pad rays-per-view to a multiple of 1024"
    rows = rpv // LANE

    n_frames = params["r_c2w"].shape[0]
    assert W * H * n_frames < (1 << 24), \
        "ray id range exceeds the exact-f32 floordiv range (use an exact int path)"

    focal, center, cam2rf, blend, exposure = _prepare(params, view_ids, W, H, is_train)
    intr = jnp.stack([1.0 / focal, center[0], center[1]]).astype(jnp.float32)

    ray_ids_p = ray_ids.astype(jnp.int32).reshape(V, rows, LANE)
    cam2rf_last = cam2rf[-1].reshape(V, 12).astype(jnp.float32)
    expo_flat = exposure.reshape(V, 9).astype(jnp.float32)

    if is_train:
        # only the last RF is active; its planes are selected via the index_map
        R_act, rf_block = 1, R - 1
        blend_act = blend[:, R - 1:].astype(jnp.float32)   # all ones
    else:
        R_act, rf_block = R, 0
        blend_act = blend.astype(jnp.float32)

    block_rows = _pick_block_rows(rows, R_act)
    return _call_kernel(ray_ids_p, rgb_rf_planar, depth_rf_planar, cam2rf_last,
                        expo_flat, blend_act, intr, W, H, rf_block, R_act, block_rows)


# ----------------------------------------------------------------------------- reference
def reference_forward(params, ray_ids, view_ids, W, H, rgb_rf, depth_rf,
                      is_train=True):
    """Pure-JAX reference mirroring the PyTorch forward semantics (flat layout)."""
    V = view_ids.shape[0]
    N = ray_ids.shape[0]
    rpv = N // V

    focal, center, cam2rf, blend, exposure = _prepare(params, view_ids, W, H, is_train)

    col = ray_ids % W
    row = (ray_ids // W) % H
    i_f, j_f = col.astype(jnp.float32), row.astype(jnp.float32)
    dirs = jnp.stack([(i_f - center[0]) / focal,
                      (j_f - center[1]) / focal,
                      jnp.ones_like(i_f)], axis=-1)

    view_of_ray = jnp.repeat(jnp.arange(V), rpv)          # repeat_interleave
    blend_rays = blend[view_of_ray]                        # (N, R)
    rgbs = jnp.einsum("nr,rnc->nc", blend_rays, rgb_rf)
    depth = jnp.einsum("nr,rn->n", blend_rays, depth_rf)
    rgbs = jnp.einsum("nij,nj->ni", exposure[view_of_ray], rgbs)  # torch.bmm
    rgbs = jnp.clip(rgbs, 0.0, 1.0)

    c2rf_last = cam2rf[-1][view_of_ray]                    # (N, 3, 4), last RF
    rays_d = jnp.sum(dirs[:, None, :] * c2rf_last[:, :, :3], axis=-1)
    rays_o = c2rf_last[:, :, 3]
    rays = jnp.concatenate([rays_o, rays_d], axis=-1)

    ij = jnp.stack([col, row], axis=-1).astype(jnp.int32)
    return rgbs, depth, dirs, ij, rays


# ----------------------------------------------------------------------------- main
if __name__ == "__main__":
    key = jax.random.PRNGKey(0)
    fov = 60.0
    W0 = H0 = 16        # module's native W, H
    W = H = 16          # render resolution
    F = 3               # total frames (poses / exposures)
    R = 2               # number of local radiance fields
    V = 2               # views rendered in this forward
    rpv = 4 * SUB * LANE  # 4096 rays per view
    N = V * rpv
    rows = rpv // LANE

    ks = jax.random.split(key, 8)
    params = {
        "W0": W0,
        # parameters created in __init__/append_frame (identity inits) plus small
        # deterministic perturbations so the math is non-trivial.
        "r_c2w": jnp.broadcast_to(jnp.eye(3, 2, dtype=jnp.float32), (F, 3, 2))
                 + 0.05 * jax.random.normal(ks[0], (F, 3, 2), jnp.float32),
        "t_c2w": 0.3 * jax.random.normal(ks[1], (F, 3), jnp.float32),
        "exposure": jnp.broadcast_to(jnp.eye(3, dtype=jnp.float32), (F, 3, 3))
                    + 0.02 * jax.random.normal(ks[2], (F, 3, 3), jnp.float32),
        "world2rf": 0.2 * jax.random.normal(ks[3], (R, 3), jnp.float32),
        "blending_weights": jax.random.uniform(ks[4], (F, R), jnp.float32),
        "init_focal": jnp.array([W0 / math.tan(fov * math.pi / 180 / 2) / 2],
                                jnp.float32),
        "focal_offset": jnp.ones((1,), jnp.float32),
        "center_rel": 0.5 * jnp.ones((2,), jnp.float32),
    }

    view_ids = jnp.array([0, 2], jnp.int32)
    ray_ids = jax.random.randint(ks[5], (N,), 0, W * H * F, jnp.int32)

    # TODO(synk): TensorVMSplit volumetric rendering (self.tensorfs[rf_id](rays, ...))
    # has no clean Pallas equivalent; its per-RF rgb/depth outputs are supplied as
    # kernel inputs in the canonical planar layout instead of being rendered here.
    rgb_rf_planar = jax.random.uniform(ks[6], (R, V, 3, rows, LANE), jnp.float32)
    depth_rf_planar = jax.random.uniform(ks[7], (R, V, rows, LANE), jnp.float32) * 4.0

    # flat views for the pure-JAX reference (test-only glue)
    rgb_rf_flat = jnp.stack([planar_to_flat(rgb_rf_planar[r]) for r in range(R)], axis=0)
    depth_rf_flat = depth_rf_planar.reshape(R, N)

    names = ["rgbs", "depth_maps", "directions", "ij", "rays"]
    for is_train in (True, False):
        out = local_tensorfs_forward(params, ray_ids, view_ids, W, H,
                                     rgb_rf_planar, depth_rf_planar,
                                     is_train=is_train)
        out = jax.block_until_ready(out)
        ref = reference_forward(params, ray_ids, view_ids, W, H,
                                rgb_rf_flat, depth_rf_flat, is_train=is_train)

        rgbs_p, depth_p, dirs_p, ij_p, rays_p = out
        got = (planar_to_flat(rgbs_p), depth_p.reshape(N),
               planar_to_flat(dirs_p), planar_to_flat(ij_p), planar_to_flat(rays_p))
        for name, a, b in zip(names, got, ref):
            if a.dtype == jnp.int32:
                assert bool((a == b.astype(a.dtype)).all()), \
                    f"mismatch in {name} (is_train={is_train})"
            else:
                assert bool(jnp.allclose(a, b, rtol=1e-5, atol=1e-5)), \
                    f"mismatch in {name} (is_train={is_train})"

    print("KERNEL_OK")
</pallas_src>

<mosaic_0001>
module attributes {stable_mosaic.version = 11 : i64} {
  func.func @kernel(%arg0: i32, %arg1: i32, %arg2: memref<1x32x128xi32, #tpu.memory_space<vmem>>, %arg3: memref<1x1x3x32x128xf32, #tpu.memory_space<vmem>>, %arg4: memref<1x1x32x128xf32, #tpu.memory_space<vmem>>, %arg5: memref<2x12xf32, #tpu.memory_space<smem>>, %arg6: memref<2x9xf32, #tpu.memory_space<smem>>, %arg7: memref<2x1xf32, #tpu.memory_space<smem>>, %arg8: memref<3xf32, #tpu.memory_space<smem>>, %arg9: memref<1x3x32x128xf32, #tpu.memory_space<vmem>>, %arg10: memref<1x32x128xf32, #tpu.memory_space<vmem>>, %arg11: memref<1x3x32x128xf32, #tpu.memory_space<vmem>>, %arg12: memref<1x2x32x128xi32, #tpu.memory_space<vmem>>, %arg13: memref<1x6x32x128xf32, #tpu.memory_space<vmem>>) attributes {dimension_semantics = [#tpu.dimension_semantics<parallel>, #tpu.dimension_semantics<parallel>], iteration_bounds = array<i64: 2, 1>, scalar_prefetch = 0 : i64, scratch_operands = 0 : i64, tpu.core_type = #tpu.core_type<tc>, window_params = [{transform_indices = @transform_0, window_bounds = array<i64: 1, 32, 128>}, {transform_indices = @transform_1, window_bounds = array<i64: 1, 1, 3, 32, 128>}, {transform_indices = @transform_2, window_bounds = array<i64: 1, 1, 32, 128>}, {transform_indices = @transform_3, window_bounds = array<i64: 2, 12>}, {transform_indices = @transform_4, window_bounds = array<i64: 2, 9>}, {transform_indices = @transform_5, window_bounds = array<i64: 2, 1>}, {transform_indices = @transform_6, window_bounds = array<i64: 3>}, {transform_indices = @transform_7, window_bounds = array<i64: 1, 3, 32, 128>}, {transform_indices = @transform_8, window_bounds = array<i64: 1, 32, 128>}, {transform_indices = @transform_9, window_bounds = array<i64: 1, 3, 32, 128>}, {transform_indices = @transform_10, window_bounds = array<i64: 1, 2, 32, 128>}, {transform_indices = @transform_11, window_bounds = array<i64: 1, 6, 32, 128>}]} {
    %c0 = arith.constant 0 : index
    %c0_0 = arith.constant 0 : index
    %c0_1 = arith.constant 0 : index
    %0 = vector.load %arg2[%c0, %c0_0, %c0_1] : memref<1x32x128xi32, #tpu.memory_space<vmem>>, vector<1x32x128xi32>
    %1 = vector.shape_cast %0 : vector<1x32x128xi32> to vector<32x128xi32>
    %2 = arith.sitofp %1 : vector<32x128xi32> to vector<32x128xf32>
    %cst = arith.constant 6.250000e-02 : f32
    %3 = vector.broadcast %cst : f32 to vector<32x128xf32>
    %4 = arith.mulf %2, %3 : vector<32x128xf32>
    %5 = math.floor %4 : vector<32x128xf32>
    %6 = arith.fptosi %5 : vector<32x128xf32> to vector<32x128xi32>
    %c16_i32 = arith.constant 16 : i32
    %7 = vector.broadcast %c16_i32 : i32 to vector<32x128xi32>
    %8 = arith.muli %6, %7 : vector<32x128xi32>
    %9 = arith.subi %1, %8 : vector<32x128xi32>
    %c0_i32 = arith.constant 0 : i32
    %10 = vector.broadcast %c0_i32 : i32 to vector<32x128xi32>
    %11 = arith.cmpi slt, %9, %10 : vector<32x128xi32>
    %c1_i32 = arith.constant 1 : i32
    %12 = vector.broadcast %c1_i32 : i32 to vector<32x128xi32>
    %13 = arith.subi %6, %12 : vector<32x128xi32>
    %14 = arith.select %11, %13, %6 : vector<32x128xi1>, vector<32x128xi32>
    %c16_i32_2 = arith.constant 16 : i32
    %15 = vector.broadcast %c16_i32_2 : i32 to vector<32x128xi32>
    %16 = arith.cmpi sge, %9, %15 : vector<32x128xi32>
    %c1_i32_3 = arith.constant 1 : i32
    %17 = vector.broadcast %c1_i32_3 : i32 to vector<32x128xi32>
    %18 = arith.addi %14, %17 : vector<32x128xi32>
    %19 = arith.select %16, %18, %14 : vector<32x128xi1>, vector<32x128xi32>
    %c16_i32_4 = arith.constant 16 : i32
    %20 = vector.broadcast %c16_i32_4 : i32 to vector<32x128xi32>
    %21 = arith.muli %19, %20 : vector<32x128xi32>
    %22 = arith.subi %1, %21 : vector<32x128xi32>
    %23 = arith.sitofp %19 : vector<32x128xi32> to vector<32x128xf32>
    %cst_5 = arith.constant 6.250000e-02 : f32
    %24 = vector.broadcast %cst_5 : f32 to vector<32x128xf32>
    %25 = arith.mulf %23, %24 : vector<32x128xf32>
    %26 = math.floor %25 : vector<32x128xf32>
    %27 = arith.fptosi %26 : vector<32x128xf32> to vector<32x128xi32>
    %c16_i32_6 = arith.constant 16 : i32
    %28 = vector.broadcast %c16_i32_6 : i32 to vector<32x128xi32>
    %29 = arith.muli %27, %28 : vector<32x128xi32>
    %30 = arith.subi %19, %29 : vector<32x128xi32>
    %c0_i32_7 = arith.constant 0 : i32
    %31 = vector.broadcast %c0_i32_7 : i32 to vector<32x128xi32>
    %32 = arith.cmpi slt, %30, %31 : vector<32x128xi32>
    %c1_i32_8 = arith.constant 1 : i32
    %33 = vector.broadcast %c1_i32_8 : i32 to vector<32x128xi32>
    %34 = arith.subi %27, %33 : vector<32x128xi32>
    %35 = arith.select %32, %34, %27 : vector<32x128xi1>, vector<32x128xi32>
    %c16_i32_9 = arith.constant 16 : i32
    %36 = vector.broadcast %c16_i32_9 : i32 to vector<32x128xi32>
    %37 = arith.cmpi sge, %30, %36 : vector<32x128xi32>
    %c1_i32_10 = arith.constant 1 : i32
    %38 = vector.broadcast %c1_i32_10 : i32 to vector<32x128xi32>
    %39 = arith.addi %35, %38 : vector<32x128xi32>
    %40 = arith.select %37, %39, %35 : vector<32x128xi1>, vector<32x128xi32>
    %c16_i32_11 = arith.constant 16 : i32
    %41 = vector.broadcast %c16_i32_11 : i32 to vector<32x128xi32>
    %42 = arith.muli %40, %41 : vector<32x128xi32>
    %43 = arith.subi %19, %42 : vector<32x128xi32>
    %c0_12 = arith.constant 0 : index
    %44 = memref.load %arg8[%c0_12] : memref<3xf32, #tpu.memory_space<smem>>
    %c1 = arith.constant 1 : index
    %45 = memref.load %arg8[%c1] : memref<3xf32, #tpu.memory_space<smem>>
    %c2 = arith.constant 2 : index
    %46 = memref.load %arg8[%c2] : memref<3xf32, #tpu.memory_space<smem>>
    %47 = arith.sitofp %22 : vector<32x128xi32> to vector<32x128xf32>
    %48 = vector.broadcast %45 : f32 to vector<32x128xf32>
    %49 = arith.subf %47, %48 : vector<32x128xf32>
    %50 = vector.broadcast %44 : f32 to vector<32x128xf32>
    %51 = arith.mulf %49, %50 : vector<32x128xf32>
    %52 = arith.sitofp %43 : vector<32x128xi32> to vector<32x128xf32>
    %53 = vector.broadcast %46 : f32 to vector<32x128xf32>
    %54 = arith.subf %52, %53 : vector<32x128xf32>
    %55 = vector.broadcast %44 : f32 to vector<32x128xf32>
    %56 = arith.mulf %54, %55 : vector<32x128xf32>
    %c0_13 = arith.constant 0 : index
    %c0_14 = arith.constant 0 : index
    %c0_15 = arith.constant 0 : index
    %c0_16 = arith.constant 0 : index
    %57 = vector.load %arg11[%c0_13, %c0_14, %c0_15, %c0_16] : memref<1x3x32x128xf32, #tpu.memory_space<vmem>>, vector<1x1x32x128xf32>
    %58 = vector.shape_cast %57 : vector<1x1x32x128xf32> to vector<32x128xf32>
    %59 = vector.shape_cast %51 : vector<32x128xf32> to vector<1x1x32x128xf32>
    tpu.vector_store %arg11[%c0_13, %c0_14, %c0_15, %c0_16], %59 {strides = array<i32>} : memref<1x3x32x128xf32, #tpu.memory_space<vmem>>, vector<1x1x32x128xf32>,
    %c0_17 = arith.constant 0 : index
    %c1_18 = arith.constant 1 : index
    %c0_19 = arith.constant 0 : index
    %c0_20 = arith.constant 0 : index
    %60 = vector.load %arg11[%c0_17, %c1_18, %c0_19, %c0_20] : memref<1x3x32x128xf32, #tpu.memory_space<vmem>>, vector<1x1x32x128xf32>
    %61 = vector.shape_cast %60 : vector<1x1x32x128xf32> to vector<32x128xf32>
    %62 = vector.shape_cast %56 : vector<32x128xf32> to vector<1x1x32x128xf32>
    tpu.vector_store %arg11[%c0_17, %c1_18, %c0_19, %c0_20], %62 {strides = array<i32>} : memref<1x3x32x128xf32, #tpu.memory_space<vmem>>, vector<1x1x32x128xf32>,
    %cst_21 = arith.constant 1.000000e+00 : f32
    %63 = vector.broadcast %cst_21 : f32 to vector<32x128xf32>
    %c0_22 = arith.constant 0 : index
    %c2_23 = arith.constant 2 : index
    %c0_24 = arith.constant 0 : index
    %c0_25 = arith.constant 0 : index
    %64 = vector.load %arg11[%c0_22, %c2_23, %c0_24, %c0_25] : memref<1x3x32x128xf32, #tpu.memory_space<vmem>>, vector<1x1x32x128xf32>
    %65 = vector.shape_cast %64 : vector<1x1x32x128xf32> to vector<32x128xf32>
    %66 = vector.shape_cast %63 : vector<32x128xf32> to vector<1x1x32x128xf32>
    tpu.vector_store %arg11[%c0_22, %c2_23, %c0_24, %c0_25], %66 {strides = array<i32>} : memref<1x3x32x128xf32, #tpu.memory_space<vmem>>, vector<1x1x32x128xf32>,
    %c0_26 = arith.constant 0 : index
    %c0_27 = arith.constant 0 : index
    %c0_28 = arith.constant 0 : index
    %c0_29 = arith.constant 0 : index
    %67 = vector.load %arg12[%c0_26, %c0_27, %c0_28, %c0_29] : memref<1x2x32x128xi32, #tpu.memory_space<vmem>>, vector<1x1x32x128xi32>
    %68 = vector.shape_cast %67 : vector<1x1x32x128xi32> to vector<32x128xi32>
    %69 = vector.shape_cast %22 : vector<32x128xi32> to vector<1x1x32x128xi32>
    tpu.vector_store %arg12[%c0_26, %c0_27, %c0_28, %c0_29], %69 {strides = array<i32>} : memref<1x2x32x128xi32, #tpu.memory_space<vmem>>, vector<1x1x32x128xi32>,
    %c0_30 = arith.constant 0 : index
    %c1_31 = arith.constant 1 : index
    %c0_32 = arith.constant 0 : index
    %c0_33 = arith.constant 0 : index
    %70 = vector.load %arg12[%c0_30, %c1_31, %c0_32, %c0_33] : memref<1x2x32x128xi32, #tpu.memory_space<vmem>>, vector<1x1x32x128xi32>
    %71 = vector.shape_cast %70 : vector<1x1x32x128xi32> to vector<32x128xi32>
    %72 = vector.shape_cast %43 : vector<32x128xi32> to vector<1x1x32x128xi32>
    tpu.vector_store %arg12[%c0_30, %c1_31, %c0_32, %c0_33], %72 {strides = array<i32>} : memref<1x2x32x128xi32, #tpu.memory_space<vmem>>, vector<1x1x32x128xi32>,
    %cst_34 = arith.constant 0.000000e+00 : f32
    %73 = vector.broadcast %cst_34 : f32 to vector<32x128xf32>
    %cst_35 = arith.constant 0.000000e+00 : f32
    %74 = vector.broadcast %cst_35 : f32 to vector<32x128xf32>
    %cst_36 = arith.constant 0.000000e+00 : f32
    %75 = vector.broadcast %cst_36 : f32 to vector<32x128xf32>
    %cst_37 = arith.constant 0.000000e+00 : f32
    %76 = vector.broadcast %cst_37 : f32 to vector<32x128xf32>
    %77 = arith.index_cast %arg0 : i32 to index
    %c0_38 = arith.constant 0 : index
    %78 = memref.load %arg7[%77, %c0_38] : memref<2x1xf32, #tpu.memory_space<smem>>
    %c0_39 = arith.constant 0 : index
    %c0_40 = arith.constant 0 : index
    %c0_41 = arith.constant 0 : index
    %c0_42 = arith.constant 0 : index
    %c0_43 = arith.constant 0 : index
    %79 = vector.load %arg3[%c0_39, %c0_40, %c0_41, %c0_42, %c0_43] : memref<1x1x3x32x128xf32, #tpu.memory_space<vmem>>, vector<1x1x1x32x128xf32>
    %80 = vector.shape_cast %79 : vector<1x1x1x32x128xf32> to vector<32x128xf32>
    %81 = vector.broadcast %78 : f32 to vector<32x128xf32>
    %82 = arith.mulf %81, %80 : vector<32x128xf32>
    %83 = arith.addf %73, %82 : vector<32x128xf32>
    %c0_44 = arith.constant 0 : index
    %c0_45 = arith.constant 0 : index
    %c1_46 = arith.constant 1 : index
    %c0_47 = arith.constant 0 : index
    %c0_48 = arith.constant 0 : index
    %84 = vector.load %arg3[%c0_44, %c0_45, %c1_46, %c0_47, %c0_48] : memref<1x1x3x32x128xf32, #tpu.memory_space<vmem>>, vector<1x1x1x32x128xf32>
    %85 = vector.shape_cast %84 : vector<1x1x1x32x128xf32> to vector<32x128xf32>
    %86 = vector.broadcast %78 : f32 to vector<32x128xf32>
    %87 = arith.mulf %86, %85 : vector<32x128xf32>
    %88 = arith.addf %74, %87 : vector<32x128xf32>
    %c0_49 = arith.constant 0 : index
    %c0_50 = arith.constant 0 : index
    %c2_51 = arith.constant 2 : index
    %c0_52 = arith.constant 0 : index
    %c0_53 = arith.constant 0 : index
    %89 = vector.load %arg3[%c0_49, %c0_50, %c2_51, %c0_52, %c0_53] : memref<1x1x3x32x128xf32, #tpu.memory_space<vmem>>, vector<1x1x1x32x128xf32>
    %90 = vector.shape_cast %89 : vector<1x1x1x32x128xf32> to vector<32x128xf32>
    %91 = vector.broadcast %78 : f32 to vector<32x128xf32>
    %92 = arith.mulf %91, %90 : vector<32x128xf32>
    %93 = arith.addf %75, %92 : vector<32x128xf32>
    %c0_54 = arith.constant 0 : index
    %c0_55 = arith.constant 0 : index
    %c0_56 = arith.constant 0 : index
    %c0_57 = arith.constant 0 : index
    %94 = vector.load %arg4[%c0_54, %c0_55, %c0_56, %c0_57] : memref<1x1x32x128xf32, #tpu.memory_space<vmem>>, vector<1x1x32x128xf32>
    %95 = vector.shape_cast %94 : vector<1x1x32x128xf32> to vector<32x128xf32>
    %96 = vector.broadcast %78 : f32 to vector<32x128xf32>
    %97 = arith.mulf %96, %95 : vector<32x128xf32>
    %98 = arith.addf %76, %97 : vector<32x128xf32>
    %99 = arith.index_cast %arg0 : i32 to index
    %c0_58 = arith.constant 0 : index
    %100 = memref.load %arg5[%99, %c0_58] : memref<2x12xf32, #tpu.memory_space<smem>>
    %101 = arith.index_cast %arg0 : i32 to index
    %c1_59 = arith.constant 1 : index
    %102 = memref.load %arg5[%101, %c1_59] : memref<2x12xf32, #tpu.memory_space<smem>>
    %103 = arith.index_cast %arg0 : i32 to index
    %c2_60 = arith.constant 2 : index
    %104 = memref.load %arg5[%103, %c2_60] : memref<2x12xf32, #tpu.memory_space<smem>>
    %105 = arith.index_cast %arg0 : i32 to index
    %c3 = arith.constant 3 : index
    %106 = memref.load %arg5[%105, %c3] : memref<2x12xf32, #tpu.memory_space<smem>>
    %107 = arith.index_cast %arg0 : i32 to index
    %c4 = arith.constant 4 : index
    %108 = memref.load %arg5[%107, %c4] : memref<2x12xf32, #tpu.memory_space<smem>>
    %109 = arith.index_cast %arg0 : i32 to index
    %c5 = arith.constant 5 : index
    %110 = memref.load %arg5[%109, %c5] : memref<2x12xf32, #tpu.memory_space<smem>>
    %111 = arith.index_cast %arg0 : i32 to index
    %c6 = arith.constant 6 : index
    %112 = memref.load %arg5[%111, %c6] : memref<2x12xf32, #tpu.memory_space<smem>>
    %113 = arith.index_cast %arg0 : i32 to index
    %c7 = arith.constant 7 : index
    %114 = memref.load %arg5[%113, %c7] : memref<2x12xf32, #tpu.memory_space<smem>>
    %115 = arith.index_cast %arg0 : i32 to index
    %c8 = arith.constant 8 : index
    %116 = memref.load %arg5[%115, %c8] : memref<2x12xf32, #tpu.memory_space<smem>>
    %117 = arith.index_cast %arg0 : i32 to index
    %c9 = arith.constant 9 : index
    %118 = memref.load %arg5[%117, %c9] : memref<2x12xf32, #tpu.memory_space<smem>>
    %119 = arith.index_cast %arg0 : i32 to index
    %c10 = arith.constant 10 : index
    %120 = memref.load %arg5[%119, %c10] : memref<2x12xf32, #tpu.memory_space<smem>>
    %121 = arith.index_cast %arg0 : i32 to index
    %c11 = arith.constant 11 : index
    %122 = memref.load %arg5[%121, %c11] : memref<2x12xf32, #tpu.memory_space<smem>>
    %cst_61 = arith.constant 0.000000e+00 : f32
    %123 = vector.broadcast %cst_61 : f32 to vector<32x128xf32>
    %124 = vector.broadcast %106 : f32 to vector<32x128xf32>
    %125 = arith.addf %123, %124 : vector<32x128xf32>
    %c0_62 = arith.constant 0 : index
    %c0_63 = arith.constant 0 : index
    %c0_64 = arith.constant 0 : index
    %c0_65 = arith.constant 0 : index
    %126 = vector.load %arg13[%c0_62, %c0_63, %c0_64, %c0_65] : memref<1x6x32x128xf32, #tpu.memory_space<vmem>>, vector<1x1x32x128xf32>
    %127 = vector.shape_cast %126 : vector<1x1x32x128xf32> to vector<32x128xf32>
    %128 = vector.shape_cast %125 : vector<32x128xf32> to vector<1x1x32x128xf32>
    tpu.vector_store %arg13[%c0_62, %c0_63, %c0_64, %c0_65], %128 {strides = array<i32>} : memref<1x6x32x128xf32, #tpu.memory_space<vmem>>, vector<1x1x32x128xf32>,
    %129 = vector.broadcast %114 : f32 to vector<32x128xf32>
    %130 = arith.addf %123, %129 : vector<32x128xf32>
    %c0_66 = arith.constant 0 : index
    %c1_67 = arith.constant 1 : index
    %c0_68 = arith.constant 0 : index
    %c0_69 = arith.constant 0 : index
    %131 = vector.load %arg13[%c0_66, %c1_67, %c0_68, %c0_69] : memref<1x6x32x128xf32, #tpu.memory_space<vmem>>, vector<1x1x32x128xf32>
    %132 = vector.shape_cast %131 : vector<1x1x32x128xf32> to vector<32x128xf32>
    %133 = vector.shape_cast %130 : vector<32x128xf32> to vector<1x1x32x128xf32>
    tpu.vector_store %arg13[%c0_66, %c1_67, %c0_68, %c0_69], %133 {strides = array<i32>} : memref<1x6x32x128xf32, #tpu.memory_space<vmem>>, vector<1x1x32x128xf32>,
    %134 = vector.broadcast %122 : f32 to vector<32x128xf32>
    %135 = arith.addf %123, %134 : vector<32x128xf32>
    %c0_70 = arith.constant 0 : index
    %c2_71 = arith.constant 2 : index
    %c0_72 = arith.constant 0 : index
    %c0_73 = arith.constant 0 : index
    %136 = vector.load %arg13[%c0_70, %c2_71, %c0_72, %c0_73] : memref<1x6x32x128xf32, #tpu.memory_space<vmem>>, vector<1x1x32x128xf32>
    %137 = vector.shape_cast %136 : vector<1x1x32x128xf32> to vector<32x128xf32>
    %138 = vector.shape_cast %135 : vector<32x128xf32> to vector<1x1x32x128xf32>
    tpu.vector_store %arg13[%c0_70, %c2_71, %c0_72, %c0_73], %138 {strides = array<i32>} : memref<1x6x32x128xf32, #tpu.memory_space<vmem>>, vector<1x1x32x128xf32>,
    %139 = vector.broadcast %100 : f32 to vector<32x128xf32>
    %140 = arith.mulf %139, %51 : vector<32x128xf32>
    %141 = vector.broadcast %102 : f32 to vector<32x128xf32>
    %142 = arith.mulf %141, %56 : vector<32x128xf32>
    %143 = arith.addf %140, %142 : vector<32x128xf32>
    %144 = vector.broadcast %104 : f32 to vector<32x128xf32>
    %145 = arith.addf %143, %144 : vector<32x128xf32>
    %c0_74 = arith.constant 0 : index
    %c3_75 = arith.constant 3 : index
    %c0_76 = arith.constant 0 : index
    %c0_77 = arith.constant 0 : index
    %146 = vector.load %arg13[%c0_74, %c3_75, %c0_76, %c0_77] : memref<1x6x32x128xf32, #tpu.memory_space<vmem>>, vector<1x1x32x128xf32>
    %147 = vector.shape_cast %146 : vector<1x1x32x128xf32> to vector<32x128xf32>
    %148 = vector.shape_cast %145 : vector<32x128xf32> to vector<1x1x32x128xf32>
    tpu.vector_store %arg13[%c0_74, %c3_75, %c0_76, %c0_77], %148 {strides = array<i32>} : memref<1x6x32x128xf32, #tpu.memory_space<vmem>>, vector<1x1x32x128xf32>,
    %149 = vector.broadcast %108 : f32 to vector<32x128xf32>
    %150 = arith.mulf %149, %51 : vector<32x128xf32>
    %151 = vector.broadcast %110 : f32 to vector<32x128xf32>
    %152 = arith.mulf %151, %56 : vector<32x128xf32>
    %153 = arith.addf %150, %152 : vector<32x128xf32>
    %154 = vector.broadcast %112 : f32 to vector<32x128xf32>
    %155 = arith.addf %153, %154 : vector<32x128xf32>
    %c0_78 = arith.constant 0 : index
    %c4_79 = arith.constant 4 : index
    %c0_80 = arith.constant 0 : index
    %c0_81 = arith.constant 0 : index
    %156 = vector.load %arg13[%c0_78, %c4_79, %c0_80, %c0_81] : memref<1x6x32x128xf32, #tpu.memory_space<vmem>>, vector<1x1x32x128xf32>
    %157 = vector.shape_cast %156 : vector<1x1x32x128xf32> to vector<32x128xf32>
    %158 = vector.shape_cast %155 : vector<32x128xf32> to vector<1x1x32x128xf32>
    tpu.vector_store %arg13[%c0_78, %c4_79, %c0_80, %c0_81], %158 {strides = array<i32>} : memref<1x6x32x128xf32, #tpu.memory_space<vmem>>, vector<1x1x32x128xf32>,
    %159 = vector.broadcast %116 : f32 to vector<32x128xf32>
    %160 = arith.mulf %159, %51 : vector<32x128xf32>
    %161 = vector.broadcast %118 : f32 to vector<32x128xf32>
    %162 = arith.mulf %161, %56 : vector<32x128xf32>
    %163 = arith.addf %160, %162 : vector<32x128xf32>
    %164 = vector.broadcast %120 : f32 to vector<32x128xf32>
    %165 = arith.addf %163, %164 : vector<32x128xf32>
    %c0_82 = arith.constant 0 : index
    %c5_83 = arith.constant 5 : index
    %c0_84 = arith.constant 0 : index
    %c0_85 = arith.constant 0 : index
    %166 = vector.load %arg13[%c0_82, %c5_83, %c0_84, %c0_85] : memref<1x6x32x128xf32, #tpu.memory_space<vmem>>, vector<1x1x32x128xf32>
    %167 = vector.shape_cast %166 : vector<1x1x32x128xf32> to vector<32x128xf32>
    %168 = vector.shape_cast %165 : vector<32x128xf32> to vector<1x1x32x128xf32>
    tpu.vector_store %arg13[%c0_82, %c5_83, %c0_84, %c0_85], %168 {strides = array<i32>} : memref<1x6x32x128xf32, #tpu.memory_space<vmem>>, vector<1x1x32x128xf32>,
    %169 = arith.index_cast %arg0 : i32 to index
    %c0_86 = arith.constant 0 : index
    %170 = memref.load %arg6[%169, %c0_86] : memref<2x9xf32, #tpu.memory_space<smem>>
    %171 = arith.index_cast %arg0 : i32 to index
    %c1_87 = arith.constant 1 : index
    %172 = memref.load %arg6[%171, %c1_87] : memref<2x9xf32, #tpu.memory_space<smem>>
    %173 = arith.index_cast %arg0 : i32 to index
    %c2_88 = arith.constant 2 : index
    %174 = memref.load %arg6[%173, %c2_88] : memref<2x9xf32, #tpu.memory_space<smem>>
    %175 = arith.index_cast %arg0 : i32 to index
    %c3_89 = arith.constant 3 : index
    %176 = memref.load %arg6[%175, %c3_89] : memref<2x9xf32, #tpu.memory_space<smem>>
    %177 = arith.index_cast %arg0 : i32 to index
    %c4_90 = arith.constant 4 : index
    %178 = memref.load %arg6[%177, %c4_90] : memref<2x9xf32, #tpu.memory_space<smem>>
    %179 = arith.index_cast %arg0 : i32 to index
    %c5_91 = arith.constant 5 : index
    %180 = memref.load %arg6[%179, %c5_91] : memref<2x9xf32, #tpu.memory_space<smem>>
    %181 = arith.index_cast %arg0 : i32 to index
    %c6_92 = arith.constant 6 : index
    %182 = memref.load %arg6[%181, %c6_92] : memref<2x9xf32, #tpu.memory_space<smem>>
    %183 = arith.index_cast %arg0 : i32 to index
    %c7_93 = arith.constant 7 : index
    %184 = memref.load %arg6[%183, %c7_93] : memref<2x9xf32, #tpu.memory_space<smem>>
    %185 = arith.index_cast %arg0 : i32 to index
    %c8_94 = arith.constant 8 : index
    %186 = memref.load %arg6[%185, %c8_94] : memref<2x9xf32, #tpu.memory_space<smem>>
    %187 = vector.broadcast %170 : f32 to vector<32x128xf32>
    %188 = arith.mulf %187, %83 : vector<32x128xf32>
    %189 = vector.broadcast %172 : f32 to vector<32x128xf32>
    %190 = arith.mulf %189, %88 : vector<32x128xf32>
    %191 = arith.addf %188, %190 : vector<32x128xf32>
    %192 = vector.broadcast %174 : f32 to vector<32x128xf32>
    %193 = arith.mulf %192, %93 : vector<32x128xf32>
    %194 = arith.addf %191, %193 : vector<32x128xf32>
    %cst_95 = arith.constant 0.000000e+00 : f32
    %cst_96 = arith.constant 1.000000e+00 : f32
    %195 = vector.broadcast %cst_95 : f32 to vector<32x128xf32>
    %196 = arith.maximumf %195, %194 : vector<32x128xf32>
    %197 = vector.broadcast %cst_96 : f32 to vector<32x128xf32>
    %198 = arith.minimumf %197, %196 : vector<32x128xf32>
    %c0_97 = arith.constant 0 : index
    %c0_98 = arith.constant 0 : index
    %c0_99 = arith.constant 0 : index
    %c0_100 = arith.constant 0 : index
    %199 = vector.load %arg9[%c0_97, %c0_98, %c0_99, %c0_100] : memref<1x3x32x128xf32, #tpu.memory_space<vmem>>, vector<1x1x32x128xf32>
    %200 = vector.shape_cast %199 : vector<1x1x32x128xf32> to vector<32x128xf32>
    %201 = vector.shape_cast %198 : vector<32x128xf32> to vector<1x1x32x128xf32>
    tpu.vector_store %arg9[%c0_97, %c0_98, %c0_99, %c0_100], %201 {strides = array<i32>} : memref<1x3x32x128xf32, #tpu.memory_space<vmem>>, vector<1x1x32x128xf32>,
    %202 = vector.broadcast %176 : f32 to vector<32x128xf32>
    %203 = arith.mulf %202, %83 : vector<32x128xf32>
    %204 = vector.broadcast %178 : f32 to vector<32x128xf32>
    %205 = arith.mulf %204, %88 : vector<32x128xf32>
    %206 = arith.addf %203, %205 : vector<32x128xf32>
    %207 = vector.broadcast %180 : f32 to vector<32x128xf32>
    %208 = arith.mulf %207, %93 : vector<32x128xf32>
    %209 = arith.addf %206, %208 : vector<32x128xf32>
    %cst_101 = arith.constant 0.000000e+00 : f32
    %cst_102 = arith.constant 1.000000e+00 : f32
    %210 = vector.broadcast %cst_101 : f32 to vector<32x128xf32>
    %211 = arith.maximumf %210, %209 : vector<32x128xf32>
    %212 = vector.broadcast %cst_102 : f32 to vector<32x128xf32>
    %213 = arith.minimumf %212, %211 : vector<32x128xf32>
    %c0_103 = arith.constant 0 : index
    %c1_104 = arith.constant 1 : index
    %c0_105 = arith.constant 0 : index
    %c0_106 = arith.constant 0 : index
    %214 = vector.load %arg9[%c0_103, %c1_104, %c0_105, %c0_106] : memref<1x3x32x128xf32, #tpu.memory_space<vmem>>, vector<1x1x32x128xf32>
    %215 = vector.shape_cast %214 : vector<1x1x32x128xf32> to vector<32x128xf32>
    %216 = vector.shape_cast %213 : vector<32x128xf32> to vector<1x1x32x128xf32>
    tpu.vector_store %arg9[%c0_103, %c1_104, %c0_105, %c0_106], %216 {strides = array<i32>} : memref<1x3x32x128xf32, #tpu.memory_space<vmem>>, vector<1x1x32x128xf32>,
    %217 = vector.broadcast %182 : f32 to vector<32x128xf32>
    %218 = arith.mulf %217, %83 : vector<32x128xf32>
    %219 = vector.broadcast %184 : f32 to vector<32x128xf32>
    %220 = arith.mulf %219, %88 : vector<32x128xf32>
    %221 = arith.addf %218, %220 : vector<32x128xf32>
    %222 = vector.broadcast %186 : f32 to vector<32x128xf32>
    %223 = arith.mulf %222, %93 : vector<32x128xf32>
    %224 = arith.addf %221, %223 : vector<32x128xf32>
    %cst_107 = arith.constant 0.000000e+00 : f32
    %cst_108 = arith.constant 1.000000e+00 : f32
    %225 = vector.broadcast %cst_107 : f32 to vector<32x128xf32>
    %226 = arith.maximumf %225, %224 : vector<32x128xf32>
    %227 = vector.broadcast %cst_108 : f32 to vector<32x128xf32>
    %228 = arith.minimumf %227, %226 : vector<32x128xf32>
    %c0_109 = arith.constant 0 : index
    %c2_110 = arith.constant 2 : index
    %c0_111 = arith.constant 0 : index
    %c0_112 = arith.constant 0 : index
    %229 = vector.load %arg9[%c0_109, %c2_110, %c0_111, %c0_112] : memref<1x3x32x128xf32, #tpu.memory_space<vmem>>, vector<1x1x32x128xf32>
    %230 = vector.shape_cast %229 : vector<1x1x32x128xf32> to vector<32x128xf32>
    %231 = vector.shape_cast %228 : vector<32x128xf32> to vector<1x1x32x128xf32>
    tpu.vector_store %arg9[%c0_109, %c2_110, %c0_111, %c0_112], %231 {strides = array<i32>} : memref<1x3x32x128xf32, #tpu.memory_space<vmem>>, vector<1x1x32x128xf32>,
    %c0_113 = arith.constant 0 : index
    %c0_114 = arith.constant 0 : index
    %c0_115 = arith.constant 0 : index
    %232 = vector.load %arg10[%c0_113, %c0_114, %c0_115] : memref<1x32x128xf32, #tpu.memory_space<vmem>>, vector<1x32x128xf32>
    %233 = vector.shape_cast %232 : vector<1x32x128xf32> to vector<32x128xf32>
    %234 = vector.shape_cast %98 : vector<32x128xf32> to vector<1x32x128xf32>
    tpu.vector_store %arg10[%c0_113, %c0_114, %c0_115], %234 {strides = array<i32>} : memref<1x32x128xf32, #tpu.memory_space<vmem>>, vector<1x32x128xf32>,
    return
  }
  func.func @transform_0(%arg0: i32, %arg1: i32) -> (i32, i32, i32) {
    %c0_i32 = arith.constant 0 : i32
    %c0_i32_0 = arith.constant 0 : i32
    return %arg0, %arg1, %c0_i32 : i32, i32, i32
  }
  func.func @transform_1(%arg0: i32, %arg1: i32) -> (i32, i32, i32, i32, i32) {
    %c1_i32 = arith.constant 1 : i32
    %c0_i32 = arith.constant 0 : i32
    %c0_i32_0 = arith.constant 0 : i32
    %c0_i32_1 = arith.constant 0 : i32
    return %c1_i32, %arg0, %c0_i32, %arg1, %c0_i32_0 : i32, i32, i32, i32, i32
  }
  func.func @transform_2(%arg0: i32, %arg1: i32) -> (i32, i32, i32, i32) {
    %c1_i32 = arith.constant 1 : i32
    %c0_i32 = arith.constant 0 : i32
    %c0_i32_0 = arith.constant 0 : i32
    return %c1_i32, %arg0, %arg1, %c0_i32 : i32, i32, i32, i32
  }
  func.func @transform_3(%arg0: i32, %arg1: i32) -> (i32, i32) {
    %c0_i32 = arith.constant 0 : i32
    %c0_i32_0 = arith.constant 0 : i32
    %c0_i32_1 = arith.constant 0 : i32
    return %c0_i32, %c0_i32_0 : i32, i32
  }
  func.func @transform_4(%arg0: i32, %arg1: i32) -> (i32, i32) {
    %c0_i32 = arith.constant 0 : i32
    %c0_i32_0 = arith.constant 0 : i32
    %c0_i32_1 = arith.constant 0 : i32
    return %c0_i32, %c0_i32_0 : i32, i32
  }
  func.func @transform_5(%arg0: i32, %arg1: i32) -> (i32, i32) {
    %c0_i32 = arith.constant 0 : i32
    %c0_i32_0 = arith.constant 0 : i32
    %c0_i32_1 = arith.constant 0 : i32
    return %c0_i32, %c0_i32_0 : i32, i32
  }
  func.func @transform_6(%arg0: i32, %arg1: i32) -> i32 {
    %c0_i32 = arith.constant 0 : i32
    %c0_i32_0 = arith.constant 0 : i32
    return %c0_i32 : i32
  }
  func.func @transform_7(%arg0: i32, %arg1: i32) -> (i32, i32, i32, i32) {
    %c0_i32 = arith.constant 0 : i32
    %c0_i32_0 = arith.constant 0 : i32
    %c0_i32_1 = arith.constant 0 : i32
    return %arg0, %c0_i32, %arg1, %c0_i32_0 : i32, i32, i32, i32
  }
  func.func @transform_8(%arg0: i32, %arg1: i32) -> (i32, i32, i32) {
    %c0_i32 = arith.constant 0 : i32
    %c0_i32_0 = arith.constant 0 : i32
    return %arg0, %arg1, %c0_i32 : i32, i32, i32
  }
  func.func @transform_9(%arg0: i32, %arg1: i32) -> (i32, i32, i32, i32) {
    %c0_i32 = arith.constant 0 : i32
    %c0_i32_0 = arith.constant 0 : i32
    %c0_i32_1 = arith.constant 0 : i32
    return %arg0, %c0_i32, %arg1, %c0_i32_0 : i32, i32, i32, i32
  }
  func.func @transform_10(%arg0: i32, %arg1: i32) -> (i32, i32, i32, i32) {
    %c0_i32 = arith.constant 0 : i32
    %c0_i32_0 = arith.constant 0 : i32
    %c0_i32_1 = arith.constant 0 : i32
    return %arg0, %c0_i32, %arg1, %c0_i32_0 : i32, i32, i32, i32
  }
  func.func @transform_11(%arg0: i32, %arg1: i32) -> (i32, i32, i32, i32) {
    %c0_i32 = arith.constant 0 : i32
    %c0_i32_0 = arith.constant 0 : i32
    %c0_i32_1 = arith.constant 0 : i32
    return %arg0, %c0_i32, %arg1, %c0_i32_0 : i32, i32, i32, i32
  }
}

</mosaic_0001>

<bundles_post_ra>
// kernel: tpu_custom_call.1
= control target key start
LH: loop header
LB: loop body
LE: loop exit
PB: predicated region body
PF: predicated region fallthrough
CT: control target
= control target key end

     0   :  { %s3107_s0 = inlined_call_operand.hbm [shape: s32[2,32,128], index: 0, kind: input, shape index: {}]   ;;  %s3108_s1 = inlined_call_operand.hbm [shape: f32[2,2,3,32,128], index: 1, kind: input, shape index: {}]   ;;  %s3109_s2 = inlined_call_operand.hbm [shape: f32[2,2,32,128], index: 2, kind: input, shape index: {}]   ;;  %s3110_s3 = inlined_call_operand.vmem [shape: f32[2,12], index: 3, kind: input, shape index: {}]   ;;  %s3111_s4 = inlined_call_operand.vmem [shape: f32[2,9], index: 4, kind: input, shape index: {}]   ;;  %s3112_s5 = inlined_call_operand.vmem [shape: f32[2,1], index: 5, kind: input, shape index: {}]   ;;  %s3113_s6 = inlined_call_operand.vmem [shape: f32[3], index: 6, kind: input, shape index: {}]   ;;  %s3114_s7 = inlined_call_operand.hbm [shape: f32[2,3,32,128], index: 7, kind: output, shape index: {0}]   ;;  %s3115_s8 = inlined_call_operand.hbm [shape: f32[2,32,128], index: 8, kind: output, shape index: {1}]   ;;  %s3116_s9 = inlined_call_operand.hbm [shape: f32[2,3,32,128], index: 9, kind: output, shape index: {2}]   ;;  %s3117_s10 = inlined_call_operand.hbm [shape: s32[2,2,32,128], index: 10, kind: output, shape index: {3}]   ;;  %s3118_s11 = inlined_call_operand.hbm [shape: f32[2,6,32,128], index: 11, kind: output, shape index: {4}]  }
   0x1   :  { %3145 = sst [smem:[#allocation36_spill]] %s3107_s0 }
   0x2   :  { %3146 = sst [smem:[#allocation37_spill]] %s3108_s1 }
   0x3   :  { %3147 = sst [smem:[#allocation38_spill]] %s3109_s2 }
   0x4   :  { %3148 = sst [smem:[#allocation39_spill]] %s3110_s3 }
   0x5   :  { %3149 = sst [smem:[#allocation40_spill]] %s3111_s4 }
   0x6   :  { %3150 = sst [smem:[#allocation41_spill]] %s3114_s7 }
   0x7   :  { %3151 = sst [smem:[#allocation42_spill]] %s3116_s9 }
   0x8   :  { %3152 = sst [smem:[#allocation43_spill]] %s3117_s10 }
   0x9   :  { %3153 = sst [smem:[#allocation44_spill]] %s3118_s11 }
   0xa   :  { %17 = vsyncpa [#allocation3], 0 }
   0xb   :  { %19 = vsyncpa [#allocation3 + $0x1], 0 }
   0xc   :  { %20 = vsyncpa [#allocation7], 0 }
   0xd   :  { %22 = vsyncpa [#allocation7 + $0x1], 0 }
   0xe   :  { %23 = vsyncpa [#allocation5], 0 }
   0xf   :  { %24 = vsyncpa [#allocation11], 0 }
  0x10   :  { %25 = vsyncpa [#allocation14], 0 }
  0x11   :  { %26 = vsyncpa [#allocation4], 0 }
  0x12   :  { %28 = vsyncpa [#allocation4 + $0x1], 0 }
  0x13   :  { %29 = vsyncpa [#allocation17], 0 }
  0x14   :  { %31 = vsyncpa [#allocation17 + $0x1], 0 }
  0x15   :  { %32 = vsyncpa [#allocation20], 0 }
  0x16   :  { %34 = vsyncpa [#allocation20 + $0x1], 0  ;;  %s2182_s17 = smov 0   ;;  %s2184_s18 = smov 0  }
  0x17   :  { %s2186_s19 = smov 0   ;;  %s2188_s20 = smov 0  }
  0x18   :  { %s2190_s21 = smov 0   ;;  %s2192_s22 = smov 0  }
  0x19 LB: > { %3154 = sst [smem:[#allocation30_spill]] %s2083_s17  ;;  %s2213_s23 = sadd.s32 4294967295, %s2103_s22   ;;  %s2103_s22 = sphi %s2192_s22, %s40_s22   ;;  %s2099_s21 = sphi %s2190_s21, %s3218_s21   ;;  %s2095_s20 = sphi %s2188_s20, %s3217_s20   ;;  %s2091_s19 = sphi %s2186_s19, %s3213_s19   ;;  %s2087_s18 = sphi %s2184_s18, %s3216_s18   ;;  %s2083_s17 = sphi %s2182_s17, %s3215_s17  }
  0x1a   : > { %3155 = sst [smem:[#allocation31_spill]] %s2091_s19  ;;  %s3119_s24 = sadd.s32 4294967294, %s2103_s22  }
  0x1b   : > { %p74_p0 = scmp.ne.s32.totalorder %s2087_s18, %s2083_s17  ;;  %p3120_p1 = scmp.eq.s32.totalorder %s2213_s23, 0 }
  0x1c   : > { %p246_p3 = scmp.eq.s32.totalorder %s3119_s24, 1  ;;  %p1493_p5 = scmp.ge.s32.totalorder %s2103_s22, 1 }
  0x1d   : > { %p2224_p4 = por %p3120_p1, %p74_p0  ;;  %p365_p7 = scmp.lt.s32.totalorder %s2103_s22, 3 }
  0x1e   : > { %p2229_p6 = por %p246_p3, %p74_p0  ;;  %s3159_s4 = sld [smem:[#allocation40_spill]] }
  0x1f   : > { %s3156_s25 = scalar_select %p2224_p4, 1, 0 }
  0x20   : > { %s3157_s26 = scalar_select %p2229_p6, 1, 0 }
  0x21   : > { %p2237_p8 = pnand %p1493_p5, %p365_p7  ;;  %s52_s13 = sadd.s32 1, %s2099_s21 }
  0x22   : > { %3158 = sst [smem:[#allocation32_spill]] %s3157_s26  ;;  %s61_s14 = sadd.s32 1, %s2091_s19 }
  0x23   : > { %s3160_s30 = scalar_select %p2237_p8, 1, 0 }
  0x24   : > { %s389_s29 = sshll.u32 %s3159_s4, 4  ;;  %p1643_p10 = pneg %p2237_p8  ;;  %s390_s29 = int_to_ptr.vmem [resolvable:$true] %s389_s29 }
  0x25   : > { %p54_p12 = scmp.ge.s32.totalorder %s52_s13, 2  ;;  %s1749_s15 = scalar_lea.vmem %s390_s29, 32 }
  0x26   : > { %p2246_p11 = pnand %p1643_p10, %p3120_p1  ;;  %p1750_p13 = scmp.ne.s32.totalorder %s390_s29, %s1749_s15 }
  0x27   : > { %p1757_p7 = scmp.lt.s32.totalorder %s390_s29, %s390_s29  ;;  %p1758_p9 = scmp.lt.s32.totalorder %s1749_s15, %s1749_s15 }
  0x28   : > { %p3131_p0 = pneg %p2246_p11 }
  0x29   : > { %p1759_p2 = por %p1758_p9, %p1757_p7 }
  0x2a   : > { %p1752_p3 = pnand %p3131_p0, %p1750_p13 }
  0x2c   : > { %p1753_p5 = pneg %p1752_p3 }
  0x2e   : > { %p1760_p10 = pnand %p1759_p2, %p1753_p5 }
  0x30   : > { %1763 = shalt.err (!%p1760_p10)
}
  0x31   : > { %s2105_s16 = smov [#allocation10]   ;;  %s3220_s13 = smov (%p54_p12, %s52_s13), 0 }
  0x32   : > { %1649 = dma.vmem_to_smem (!%p2246_p11), %s390_s29, 32, %s2105_s16, [#allocation11]  }
  0x33   : > { %3162 = sst [smem:[#allocation33_spill]] %s3220_s13  ;;  %p68_p9 = scmp.ne.s32.totalorder %s2091_s19, %s2087_s18 }
  0x34   : > { %p69_p2 = scmp.eq.s32.totalorder %s2103_s22, 0  ;;  %s56_s27 = ssub.s32 %s2099_s21, %s3220_s13 }
  0x35   : > { %p1686_p13 = scmp.lt.s32.totalorder %s2103_s22, 2  ;;  %p59_p3 = scmp.eq.s32.totalorder %s56_s27, 0 }
  0x36   : > { %p70_p5 = por %p69_p2, %p68_p9  ;;  %p3163_p7 = scmp.eq.s32.totalorder %s2213_s23, 1 }
  0x37   : > { %s2274_s15 = sand.u32 1, %s2091_s19   ;;  %s445_s16 = sand.u32 1, %s2103_s22  }
  0x38   : > { %p2269_p10 = por %p3163_p7, %p68_p9  ;;  %p2279_p1 = pnand %p1686_p13, %p70_p5 }
  0x39   : > { %s2277_s24 = scalar_select %p59_p3, %s2091_s19, %s61_s14  }
  0x3a   : > { %s3164_s28 = scalar_select %p2269_p10, 1, 0 }
  0x3b   : > { %3166 = sst [smem:[#allocation35_spill]] %s2277_s24  ;;  %s1589_s4 = smul.u32 96, %s2274_s15 }
  0x3c   : > { %3165 = sst [smem:[#allocation34_spill]] %s3164_s28  ;;  %s1502_s27 = smul.u32 1536, %s2099_s21 }
  0x3d   : > { %s3167_s29 = scalar_select %p2279_p1, 1, 0 }
  0x3e   : > { %s3168_s3 = sld [smem:[#allocation39_spill]]  ;;  %s449_s10 = scalar_lea.vmem [#allocation6], %s1589_s4 }
  0x3f   : > { %s3169_s1 = sld [smem:[#allocation37_spill]]  ;;  %s459_s14 = sshll.u32 %s449_s10, 4  ;;  %s460_s14 = int_to_ptr.vmem [resolvable:$true] %s459_s14 }
  0x40   : > { %s2292_s19 = scalar_lea.sflag [#allocation7], %s445_s16  ;;  %p3132_p12 = pneg %p2279_p1 }
  0x41   : > { %s1777_s28 = scalar_lea.vmem %s460_s14, 1536  ;;  %s2106_s26 = smov [#allocation6]  }
  0x42   : > { %p1778_p9 = scmp.ne.s32.totalorder %s460_s14, %s1777_s28  ;;  %s1782_s13 = sshll.u32 %s2106_s26, 4  ;;  %s1783_s13 = int_to_ptr.vmem [resolvable:$false] %s1782_s13 }
  0x43   : > { %p1785_p3 = scmp.lt.s32.totalorder %s460_s14, %s1783_s13 }
  0x44   : > { %s378_s17 = sshll.u32 %s3168_s3, 4  ;;  %p1780_p2 = pnand %p1778_p9, %p3132_p12  ;;  %s379_s17 = int_to_ptr.vmem [resolvable:$true] %s378_s17 }
  0x45   : > { %s1270_s9 = scalar_lea.hbm %s3169_s1, %s1502_s27  ;;  %s1784_s3 = scalar_lea.vmem %s1783_s13, 3072 }
  0x46   : > { %s1271_s24 = scalar_lea.hbm %s1270_s9, 3072  ;;  %p1781_p13 = pneg %p1780_p2 }
  0x47   : > { %p1786_p5 = scmp.lt.s32.totalorder %s1784_s3, %s1777_s28 }
  0x49   : > { %p1787_p7 = por %p1786_p5, %p1785_p3 }
  0x4b   : > { %p1788_p0 = pnand %p1787_p7, %p1781_p13 }
  0x4d   : > { %1791 = shalt.err (!%p1788_p0)
}
  0x4e   : > { %s2107_s4 = smov 128   ;;  %s2108_s7 = smov 8  }
  0x4f   : > { %1662 = dma.hbm_to_vmem [thread:$0]  (!%p2279_p1), %s1271_s24, 1536, %s460_s14, %s2292_s19, %s2107_s4, %s2107_s4, %s2108_s7  }
  0x50   : > { %s1793_s9 = scalar_lea.vmem %s379_s17, 32  ;;  %p3170_p2 = pneg %p2246_p11 }
  0x51   : > { %p1794_p9 = scmp.ne.s32.totalorder %s379_s17, %s1793_s9  ;;  %p1801_p3 = scmp.lt.s32.totalorder %s379_s17, %s379_s17 }
  0x52   : > { %p1802_p13 = scmp.lt.s32.totalorder %s1793_s9, %s1793_s9 }
  0x53   : > { %p1796_p12 = pnand %p1794_p9, %p3170_p2 }
  0x54   : > { %p1803_p0 = por %p1802_p13, %p1801_p3 }
  0x55   : > { %p1797_p6 = pneg %p1796_p12 }
  0x57   : > { %p1804_p5 = pnand %p1803_p0, %p1797_p6 }
  0x59   : > { %1807 = shalt.err (!%p1804_p5)
}
  0x5a   : > { %s2109_s3 = smov [#allocation9]   ;;  %s400_s24 = sshll.u32 %s3112_s5, 4  ;;  %s401_s24 = int_to_ptr.vmem [resolvable:$true] %s400_s24 }
  0x5b   : > { %1646 = dma.vmem_to_smem (!%p2246_p11), %s379_s17, 32, %s2109_s3, [#allocation5]  }
  0x5c   : > { %s411_s27 = sshll.u32 %s3113_s6, 4  ;;  %s1808_s14 = scalar_lea.vmem %s401_s24, 32  ;;  %s412_s27 = int_to_ptr.vmem [resolvable:$true] %s411_s27 }
  0x5d   : > { %p1809_p12 = scmp.ne.s32.totalorder %s401_s24, %s1808_s14  ;;  %p3171_p7 = pmov %p3170_p2 }
  0x5e   : > { %p1816_p2 = scmp.lt.s32.totalorder %s401_s24, %s401_s24  ;;  %p1817_p3 = scmp.lt.s32.totalorder %s1808_s14, %s1808_s14 }
  0x5f   : > { %p1811_p6 = pnand %p1809_p12, %p3171_p7 }
  0x60   : > { %p1818_p13 = por %p1817_p3, %p1816_p2 }
  0x61   : > { %p1812_p9 = pneg %p1811_p6 }
  0x63   : > { %p1819_p0 = pnand %p1818_p13, %p1812_p9 }
  0x65   : > { %1822 = shalt.err (!%p1819_p0)
}
  0x66   : > { %s2110_s17 = smov [#allocation12]   ;;  %s1823_s26 = scalar_lea.vmem %s412_s27, 16 }
  0x67   : > { %1652 = dma.vmem_to_smem (!%p2246_p11), %s401_s24, 32, %s2110_s17, [#allocation11]  }
  0x68   : > { %p1824_p5 = scmp.ne.s32.totalorder %s412_s27, %s1823_s26  ;;  %p3172_p10 = pmov %p3171_p7 }
  0x69   : > { %p1831_p1 = scmp.lt.s32.totalorder %s412_s27, %s412_s27  ;;  %p1832_p12 = scmp.lt.s32.totalorder %s1823_s26, %s1823_s26 }
  0x6a   : > { %p1826_p4 = pnand %p1824_p5, %p3172_p10 }
  0x6b   : > { %p1833_p7 = por %p1832_p12, %p1831_p1 }
  0x6c   : > { %p1827_p8 = pneg %p1826_p4 }
  0x6e   : > { %p1834_p6 = pnand %p1833_p7, %p1827_p8 }
  0x70   : > { %1837 = shalt.err (!%p1834_p6)
}
  0x71   : > { %s2111_s13 = smov [#allocation13]   ;;  %s1499_s9 = sshll.u32 %s2274_s15, 5 }
  0x72   : > { %1655 = dma.vmem_to_smem (!%p2246_p11), %s412_s27, 16, %s2111_s13, [#allocation14]  }
  0x73   : > { %s1585_s3 = sshll.u32 %s2099_s21, 9  ;;  %s3173_s0 = sld [smem:[#allocation36_spill]] }
  0x74   : > { %s426_s28 = scalar_lea.vmem [#allocation2], %s1499_s9  ;;  %s423_s14 = scalar_lea.sflag [#allocation3], %s2274_s15 }
  0x75   : > { %s435_s16 = sshll.u32 %s426_s28, 4  ;;  %p3174_p4 = scmp.ne.s32.totalorder %s3167_s29, 0  ;;  %s436_s16 = int_to_ptr.vmem [resolvable:$true] %s435_s16 }
  0x76   : > { %s1851_s17 = scalar_lea.vmem %s436_s16, 512  ;;  %s2112_s12 = smov [#allocation2]  }
  0x77   : > { %p1852_p1 = scmp.ne.s32.totalorder %s436_s16, %s1851_s17  ;;  %p3175_p8 = pneg %p3174_p4 }
  0x78   : > { %s1856_s26 = sshll.u32 %s2112_s12, 4  ;;  %s1857_s26 = int_to_ptr.vmem [resolvable:$false] %s1856_s26 }
  0x79   : > { %s434_s24 = scalar_lea.hbm %s3173_s0, %s1585_s3  ;;  %p1854_p10 = pnand %p1852_p1, %p3175_p8 }
  0x7a   : > { %s1858_s27 = scalar_lea.vmem %s1857_s26, 1024  ;;  %p1859_p11 = scmp.lt.s32.totalorder %s436_s16, %s1857_s26 }
  0x7b   : > { %p1855_p9 = pneg %p1854_p10  ;;  %p1860_p2 = scmp.lt.s32.totalorder %s1858_s27, %s1851_s17 }
  0x7d   : > { %p1861_p3 = por %p1860_p2, %p1859_p11 }
  0x7f   : > { %p1862_p13 = pnand %p1861_p3, %p1855_p9 }
  0x81   : > { %1865 = shalt.err (!%p1862_p13)
}
  0x82   : > { %1659 = dma.hbm_to_vmem [thread:$0]  (!%p3174_p4), %s434_s24, 512, %s436_s16, %s423_s14, %s2107_s4, %s2107_s4, %s2108_s7  }
  0x83   : > { %s3176_s2 = sld [smem:[#allocation38_spill]]  ;;  %s473_s11 = scalar_lea.vmem [#allocation8], %s1499_s9 }
  0x84   : > { %s483_s28 = sshll.u32 %s473_s11, 4  ;;  %p3177_p5 = pmov %p3175_p8  ;;  %s484_s28 = int_to_ptr.vmem [resolvable:$true] %s483_s28 }
  0x85   : > { %s1879_s26 = scalar_lea.vmem %s484_s28, 512  ;;  %s2113_s17 = smov [#allocation8]  }
  0x86   : > { %p1880_p0 = scmp.ne.s32.totalorder %s484_s28, %s1879_s26  ;;  %s1884_s27 = sshll.u32 %s2113_s17, 4  ;;  %s1885_s27 = int_to_ptr.vmem [resolvable:$false] %s1884_s27 }
  0x87   : > { %s1886_s0 = scalar_lea.vmem %s1885_s27, 1024  ;;  %p1887_p6 = scmp.lt.s32.totalorder %s484_s28, %s1885_s27 }
  0x88   : > { %p1882_p12 = pnand %p1880_p0, %p3177_p5  ;;  %p1888_p1 = scmp.lt.s32.totalorder %s1886_s0, %s1879_s26 }
  0x89   : > { %s1279_s10 = scalar_lea.hbm %s3176_s2, %s1585_s3 }
  0x8a   : > { %s1280_s12 = scalar_lea.hbm %s1279_s10, 1024  ;;  %p1883_p7 = pneg %p1882_p12 }
  0x8b   : > { %p1889_p8 = por %p1888_p1, %p1887_p6 }
  0x8d   : > { %p1890_p10 = pnand %p1889_p8, %p1883_p7 }
  0x8f   : > { %1893 = shalt.err (!%p1890_p10)
}
  0x90   : > { %1665 = dma.hbm_to_vmem [thread:$0]  (!%p3174_p4), %s1280_s12, 512, %s484_s28, %s2292_s19, %s2107_s4, %s2107_s4, %s2108_s7  }
  0x91   : > { %p3178_p9 = scmp.ne.s32.totalorder %s3160_s30, 0 }
  0x92   : > { %s2355_s9 = sand.u32 (!%p3178_p9), 1, %s2087_s18   ;;  %p3179_p11 = scmp.ne.s32.totalorder (!%p3178_p9), %s3156_s25, 0 }
  0x93   : > { %495 = sbr.rel (%p3178_p9) target bundleno = 338 (0x152), region = 48  ;;  %s2358_s0 = sshll.u32 (!%p3178_p9), %s2355_s9, 5 }
  0x94   : > { %s498_s3 = scalar_lea.sflag (!%p3178_p9), [#allocation3], %s2355_s9  ;;  %s501_s24 = scalar_lea.vmem (!%p3178_p9), [#allocation2], %s2358_s0 }
  0x98   : > { %2050 = dma.done.wait (%p3179_p11), %s498_s3, 512  }
  0x99   : > { %2052 = vsyncadd (%p3179_p11), %s498_s3, 4294966784  ;;  %s2367_s19 = sand.u32 1, %s2213_s23   ;;  %s2370_s30 = smul.u32 96, %s2355_s9 }
  0x9a   : > { %s507_s29 = scalar_lea.sflag [#allocation7], %s2367_s19 }
  0x9b   : > { %s2374_s4 = scalar_lea.vmem [#allocation6], %s2370_s30 }
  0x9c   : > { %2054 = dma.done.wait (%p3179_p11), %s507_s29, 2048  }
  0x9d   : > { %2056 = vsyncadd (%p3179_p11), %s507_s29, 4294965248  ;;  %s2381_s7 = scalar_lea.vmem [#allocation8], %s2358_s0  ;;  %p3180_p4 = scmp.eq.s32.totalorder %s2213_s23, 0 }
  0x9f   : > { %2058 = dma.done.wait (%p3180_p4), [#allocation5], 32   ;;  %p3181_p2 = pmov %p3180_p4 }
  0xa1   : > { %2060 = vsyncadd (%p3181_p2), [#allocation5], 4294967264  ;;  %p3182_p3 = pmov %p3181_p2 }
  0xa2   : > { %p3183_p13 = pmov %p3181_p2 }
  0xa3   : > { %2062 = dma.done.wait (%p3182_p3), [#allocation11], 64  }
  0xa4   : > { %2064 = vsyncadd (%p3183_p13), [#allocation11], 4294967232  ;;  %p3184_p0 = pmov %p3181_p2 }
  0xa6   : > { %2066 = dma.done.wait (%p3184_p0), [#allocation14], 16   ;;  %p3185_p5 = pmov %p3184_p0 }
  0xa8   : > { %2068 = vsyncadd (%p3185_p5), [#allocation14], 4294967280 }
  0xa9   : > { %540 = sfence }
  0xaa   : > { %v2395_v0 = vld [vmem:[%s501_s24] sm:$0xff]  ;;  %v2397_v1 = vld [vmem:[%s501_s24 + $0x8] sm:$0xff]  ;;  %v2399_v2 = vld [vmem:[%s501_s24 + $0x10] sm:$0xff]  ;;  %s2402_s25 = sld [smem:[#allocation13 + $0x1]]  ;;  %s2410_s16 = sshll.u32 %s2095_s20, 7  ;;  %v2114_v16 = vmov 1.0  }
  0xab   : > { %v617_v3 = vcvt.s32.f32 %v2395_v0  ;;  %v618_v4 = vcvt.s32.f32 %v2397_v1  ;;  %v619_v5 = vcvt.s32.f32 %v2399_v2  ;;  %v2406_v6 = vld [vmem:[%s501_s24 + $0x18] sm:$0xff]  ;;  %s1524_s23 = sld [smem:[#allocation13 + $0x2]]  ;;  %s2414_s15 = scalar_lea.vmem [#allocation18], %s2370_s30  ;;  %v823_v24 = vld [vmem:[%s2381_s7] sm:$0xff]  ;;  %v824_v25 = vld [vmem:[%s2381_s7 + $0x8] sm:$0xff] }
  0xac   : > { %v620_v7 = vcvt.s32.f32 %v2406_v6  ;;  %s783_s14 = sld [smem:[#allocation12 + %s2410_s16]]  ;;  %1529 = vst [vmem:[%s2414_s15 + $0x40] sm:$0xff] %v2114_v16  ;;  %1530 = vst [vmem:[%s2414_s15 + $0x48] sm:$0xff] %v2114_v16  ;;  %s840_s13 = sadd.s32 3, %s2410_s16  ;;  %v825_v30 = vld [vmem:[%s2381_s7 + $0x10] sm:$0xff]  ;;  %v826_v35 = vld [vmem:[%s2381_s7 + $0x18] sm:$0xff] }
  0xad   : > { %v621_v8 = vmul.f32 0.0625, %v617_v3  ;;  %v622_v9 = vmul.f32 0.0625, %v618_v4  ;;  %v623_v10 = vmul.f32 0.0625, %v619_v5  ;;  %1531 = vst [vmem:[%s2414_s15 + $0x50] sm:$0xff] %v2114_v16  ;;  %1532 = vst [vmem:[%s2414_s15 + $0x58] sm:$0xff] %v2114_v16  ;;  %s2431_s10 = sld [smem:[#allocation13]] }
  0xae   : > { %v624_v11 = vmul.f32 0.0625, %v620_v7  ;;  %s2434_s11 = sld [smem:[#allocation9 + %s840_s13]]  ;;  %s848_s12 = sadd.s32 7, %s2410_s16 }
  0xaf   : > { %v625_v12 = vfloor.f32 %v621_v8  ;;  %v626_v13 = vfloor.f32 %v622_v9  ;;  %v627_v14 = vfloor.f32 %v623_v10  ;;  %s2436_s28 = sld [smem:[#allocation10 + %s840_s13]]  ;;  %s1591_s26 = smul.u32 192, %s2355_s9 }
  0xb0   : > { %v628_v15 = vfloor.f32 %v624_v11  ;;  %v2424_v26 = vstv %s2402_s25  ;;  %s2446_s17 = sld [smem:[#allocation9 + %s848_s12]]  ;;  %s2453_s27 = scalar_lea.vmem [#allocation16], %s2358_s0 }
  0xb1   : > { %v1592_v17 = vtrunc.f32 %v625_v12  ;;  %v1594_v18 = vtrunc.f32 %v626_v13  ;;  %v1596_v19 = vtrunc.f32 %v627_v14  ;;  %v2426_v28 = vstv %s1524_s23  ;;  %s1514_s3 = sshll.u32 %s2355_s9, 6  ;;  %s856_s0 = sadd.s32 11, %s2410_s16 }
  0xb2   : > { %v1598_v20 = vtrunc.f32 %v628_v15  ;;  %v2428_v29 = vstv %s783_s14  ;;  %s2477_s24 = scalar_lea.vmem [#allocation21], %s1591_s26  ;;  %s1124_s29 = sshll.u32 %s2453_s27, 4  ;;  %s2522_s29 = int_to_ptr.vmem [resolvable:$true] %s1124_s29 }
  0xb3   : > { %v1593_v21 = vcvt.f32.s32 %v1592_v17  ;;  %v1595_v22 = vcvt.f32.s32 %v1594_v18  ;;  %v1597_v23 = vcvt.f32.s32 %v1596_v19  ;;  %v827_v42 = vmul.f32 %v823_v24, %v2428_v29  ;;  %s2496_s7 = sld [smem:[#allocation10 + %s848_s12]]  ;;  %s3138_s23 = sadd.s32 1, %s2410_s16 }
  0xb4   : > { %v1599_v27 = vcvt.f32.s32 %v1598_v20  ;;  %v828_v43 = vmul.f32 %v824_v25, %v2428_v29  ;;  %v829_v46 = vmul.f32 %v825_v30, %v2428_v29  ;;  %v830_v47 = vmul.f32 %v826_v35, %v2428_v29  ;;  %s2506_s25 = sld [smem:[#allocation9 + %s856_s0]]  ;;  %s1587_s13 = sshll.u32 %s2095_s20, 9 }
  0xb5   : > { %v633_v31 = vmul.u32 16, %v1593_v21  ;;  %v1515_v32 = vadd.s32 4294967295, %v1593_v21  ;;  %v634_v33 = vmul.u32 16, %v1595_v22  ;;  %v1516_v34 = vadd.s32 4294967295, %v1595_v22  ;;  %1066 = vst [vmem:[%s2453_s27] sm:$0xff] %v827_v42  ;;  %s2512_s14 = sld [smem:[#allocation9 + %s2410_s16]]  ;;  %s2535_s26 = scalar_lea.hbm %s3115_s8, %s1587_s13 }
  0xb6   : > { %v635_v36 = vmul.u32 16, %v1597_v23  ;;  %v1517_v37 = vadd.s32 4294967295, %v1597_v23  ;;  %v636_v38 = vmul.u32 16, %v1599_v27  ;;  %v1518_v39 = vadd.s32 4294967295, %v1599_v27  ;;  %1067 = vst [vmem:[%s2453_s27 + $0x8] sm:$0xff] %v828_v43  ;;  %1068 = vst [vmem:[%s2453_s27 + $0x10] sm:$0xff] %v829_v46 }
  0xb7   : > { %v637_v40 = vsub.s32 %v2395_v0, %v633_v31  ;;  %v638_v41 = vsub.s32 %v2397_v1, %v634_v33  ;;  %1069 = vst [vmem:[%s2453_s27 + $0x18] sm:$0xff] %v830_v47  ;;  %v2461_v55 = vstv %s2431_s10  ;;  %v858_v59 = vstv %s2434_s11  ;;  %s2517_s10 = scalar_lea.vmem [#allocation19], %s1514_s3  ;;  %s2526_s11 = sld [smem:[#allocation9 + %s3138_s23]] }
  0xb8   : > { %v639_v44 = vsub.s32 %v2399_v2, %v635_v36  ;;  %v640_v45 = vsub.s32 %v2406_v6, %v636_v38  ;;  %860 = vst [vmem:[%s2477_s24] sm:$0xff] %v858_v59  ;;  %861 = vst [vmem:[%s2477_s24 + $0x8] sm:$0xff] %v858_v59  ;;  %v2491_v5 = vstv %s2436_s28  ;;  %v864_v7 = vstv %s2446_s17  ;;  %s3186_s17 = sld [smem:[#allocation34_spill]]  ;;  %s1895_s0 = scalar_lea.vmem %s2522_s29, 512 }
  0xb9   : > { %vm641_vm0 = vcmp.lt.s32.totalorder %v637_v40, 0  ;;  %vm653_vm1 = vcmp.ge.s32.totalorder %v637_v40, 16  ;;  %vm642_vm2 = vcmp.lt.s32.totalorder %v638_v41, 0  ;;  %vm654_vm3 = vcmp.ge.s32.totalorder %v638_v41, 16  ;;  %862 = vst [vmem:[%s2477_s24 + $0x10] sm:$0xff] %v858_v59  ;;  %863 = vst [vmem:[%s2477_s24 + $0x18] sm:$0xff] %v858_v59  ;;  %p1896_p12 = scmp.ne.s32.totalorder %s2522_s29, %s1895_s0 }
  0xba   : > { %v649_v48 = vsel %vm641_vm0, %v1515_v32, %v1593_v21  ;;  %v650_v49 = vsel %vm642_vm2, %v1516_v34, %v1595_v22  ;;  %vm643_vm4 = vcmp.lt.s32.totalorder %v639_v44, 0  ;;  %vm655_vm5 = vcmp.ge.s32.totalorder %v639_v44, 16  ;;  %1546 = vst [vmem:[%s2477_s24 + $0x20] sm:$0xff] %v864_v7  ;;  %1547 = vst [vmem:[%s2477_s24 + $0x28] sm:$0xff] %v864_v7  ;;  %s2115_s13 = smov [#allocation16]  }
  0xbb   : > { %v657_v50 = vadd.s32 1, %v649_v48  ;;  %v658_v51 = vadd.s32 1, %v650_v49  ;;  %v651_v52 = vsel %vm643_vm4, %v1517_v37, %v1597_v23  ;;  %vm644_vm6 = vcmp.lt.s32.totalorder %v640_v45, 0  ;;  %1548 = vst [vmem:[%s2477_s24 + $0x30] sm:$0xff] %v864_v7  ;;  %1549 = vst [vmem:[%s2477_s24 + $0x38] sm:$0xff] %v864_v7  ;;  %s1899_s28 = sshll.u32 %s2115_s13, 4  ;;  %s1900_s28 = int_to_ptr.vmem [resolvable:$false] %s1899_s28 }
  0xbc   : > { %v659_v53 = vadd.s32 1, %v651_v52  ;;  %v652_v54 = vsel %vm644_vm6, %v1518_v39, %v1599_v27  ;;  %vm656_vm7 = vcmp.ge.s32.totalorder %v640_v45, 16  ;;  %s1901_s12 = scalar_lea.vmem %s1900_s28, 1024  ;;  %p1902_p8 = scmp.lt.s32.totalorder %s2522_s29, %s1900_s28 }
  0xbd   : > { %v2464_v56 = vsel %vm653_vm1, %v657_v50, %v649_v48  ;;  %v2467_v57 = vsel %vm654_vm3, %v658_v51, %v650_v49  ;;  %v660_v58 = vadd.s32 1, %v652_v54  ;;  %p1903_p10 = scmp.lt.s32.totalorder %s1901_s12, %s1895_s0 }
  0xbe   : > { %v665_v60 = vmul.u32 16, %v2464_v56  ;;  %v673_v61 = vcvt.s32.f32 %v2464_v56  ;;  %v666_v62 = vmul.u32 16, %v2467_v57  ;;  %v674_v63 = vcvt.s32.f32 %v2467_v57  ;;  %p3187_p7 = scmp.ne.s32.totalorder %s3186_s17, 0 }
  0xbf   : > { %v2484_v3 = vsel %vm655_vm5, %v659_v53, %v651_v52  ;;  %v2487_v4 = vsel %vm656_vm7, %v660_v58, %v652_v54  ;;  %p1904_p9 = por %p1903_p10, %p1902_p8 }
  0xc0   : > { %v669_v8 = vsub.s32 %v2395_v0, %v665_v60  ;;  %v670_v9 = vsub.s32 %v2397_v1, %v666_v62  ;;  %v667_v10 = vmul.u32 16, %v2484_v3  ;;  %v675_v11 = vcvt.s32.f32 %v2484_v3  ;;  %p1897_p6 = pnand %p1896_p12, %p3187_p7 }
  0xc1   : > { %v668_v12 = vmul.u32 16, %v2487_v4  ;;  %v676_v13 = vcvt.s32.f32 %v2487_v4  ;;  %v677_v0 = vmul.f32 0.0625, %v673_v61  ;;  %v678_v14 = vmul.f32 0.0625, %v674_v63 }
  0xc2   : > { %v732_v1 = vcvt.s32.f32 %v669_v8  ;;  %773 = vst [vmem:[%s2517_s10] sm:$0xff] %v669_v8  ;;  %v733_v15 = vcvt.s32.f32 %v670_v9  ;;  %774 = vst [vmem:[%s2517_s10 + $0x8] sm:$0xff] %v670_v9  ;;  %v671_v16 = vsub.s32 %v2399_v2, %v667_v10  ;;  %v679_v17 = vmul.f32 0.0625, %v675_v11  ;;  %p1898_p1 = pneg %p1897_p6 }
  0xc3   : > { %v672_v18 = vsub.s32 %v2406_v6, %v668_v12  ;;  %v681_v19 = vfloor.f32 %v677_v0  ;;  %v682_v20 = vfloor.f32 %v678_v14  ;;  %v680_v21 = vmul.f32 0.0625, %v676_v13 }
  0xc4   : > { %v737_v22 = vsub.f32 %v732_v1, %v2424_v26  ;;  %v738_v23 = vsub.f32 %v733_v15, %v2424_v26  ;;  %v734_v24 = vcvt.s32.f32 %v671_v16  ;;  %775 = vst [vmem:[%s2517_s10 + $0x10] sm:$0xff] %v671_v16  ;;  %v683_v25 = vfloor.f32 %v679_v17  ;;  %p1905_p11 = pnand %p1904_p9, %p1898_p1 }
  0xc5   : > { %v735_v2 = vcvt.s32.f32 %v672_v18  ;;  %776 = vst [vmem:[%s2517_s10 + $0x18] sm:$0xff] %v672_v18  ;;  %v1600_v6 = vtrunc.f32 %v681_v19  ;;  %v1602_v27 = vtrunc.f32 %v682_v20  ;;  %v684_v30 = vfloor.f32 %v680_v21 }
  0xc6   : > { %v739_v31 = vsub.f32 %v734_v24, %v2424_v26  ;;  %v1604_v32 = vtrunc.f32 %v683_v25  ;;  %v2540_v33 = vmul.f32 %v2461_v55, %v737_v22  ;;  %v2543_v34 = vmul.f32 %v2461_v55, %v738_v23 }
  0xc7   : > { %v740_v35 = vsub.f32 %v735_v2, %v2424_v26  ;;  %v2547_v36 = vcvt.f32.s32 %v1600_v6  ;;  %v2549_v37 = vcvt.f32.s32 %v1602_v27  ;;  %v1606_v38 = vtrunc.f32 %v684_v30 }
  0xc8   : > { %1908 = shalt.err (!%p1905_p11)
}
  0xc9   : > { %s1909_s23 = scalar_lea.hbm %s2535_s26, 512  ;;  %s1913_s13 = scalar_lea.hbm %s3115_s8, 1024 }
  0xca   : > { %p1910_p4 = scmp.ne.s32.totalorder %s2535_s26, %s1909_s23  ;;  %p1914_p13 = scmp.lt.s32.totalorder %s2535_s26, %s3115_s8 }
  0xcb   : > { %p1915_p0 = scmp.lt.s32.totalorder %s1913_s13, %s1909_s23 }
  0xcc   : > { %p1911_p2 = pnand %p1910_p4, %p3187_p7 }
  0xcd   : > { %p1916_p5 = por %p1915_p0, %p1914_p13 }
  0xce   : > { %p1912_p3 = pneg %p1911_p2 }
  0xd0   : > { %p1917_p12 = pnand %p1916_p5, %p1912_p3 }
  0xd2   : > { %1920 = shalt.err (!%p1917_p12)
}
  0xd3   : > { %s3143_s0 = smov 128   ;;  %s2117_s27 = smov 8   ;;  %v1605_v26 = vcvt.f32.s32 %v1604_v32  ;;  %759 = vst [vmem:[%s2414_s15] sm:$0xff] %v2540_v33  ;;  %760 = vst [vmem:[%s2414_s15 + $0x8] sm:$0xff] %v2543_v34  ;;  %v2582_v39 = vmul.f32 %v2461_v55, %v739_v31  ;;  %v2585_v40 = vstv %s2496_s7  ;;  %v871_v41 = vstv %s2506_s25 }
  0xd4   : > { %s3188_s1 = scalar_lea.sflag [#allocation17], %s2367_s19  ;;  %s3189_s2 = sadd.s32 2, %s2410_s16  ;;  %v689_v42 = vmul.u32 16, %v2547_v36  ;;  %v1519_v43 = vadd.s32 4294967295, %v2547_v36  ;;  %v690_v44 = vmul.u32 16, %v2549_v37  ;;  %v1520_v45 = vadd.s32 4294967295, %v2549_v37 }
  0xd5   : > { %1634 = dma.vmem_to_hbm [thread:$0]  (%p3187_p7), %s2522_s29, 512, %s2535_s26, %s3188_s1, %s3143_s0, %s3143_s0, %s2117_s27   ;;  %v691_v46 = vmul.u32 16, %v1605_v26  ;;  %v1521_v47 = vadd.s32 4294967295, %v1605_v26  ;;  %v1607_v48 = vcvt.f32.s32 %v1606_v38  ;;  %v2603_v49 = vmul.f32 %v2461_v55, %v740_v35 }
  0xd6   : > { %s2590_s23 = sld [smem:[#allocation9 + %s3189_s2]]  ;;  %1550 = vst [vmem:[%s2477_s24 + $0x40] sm:$0xff] %v871_v41  ;;  %1551 = vst [vmem:[%s2477_s24 + $0x48] sm:$0xff] %v871_v41  ;;  %s3142_s29 = sadd.s32 4, %s2410_s16  ;;  %v693_v50 = vsub.s32 %v2464_v56, %v689_v42  ;;  %v694_v51 = vsub.s32 %v2467_v57, %v690_v44  ;;  %v878_v52 = vstv %s2512_s14  ;;  %v2611_v53 = vstv %s2526_s11 }
  0xd7   : > { %1552 = vst [vmem:[%s2477_s24 + $0x50] sm:$0xff] %v871_v41  ;;  %1553 = vst [vmem:[%s2477_s24 + $0x58] sm:$0xff] %v871_v41  ;;  %s3141_s7 = sadd.s32 5, %s2410_s16  ;;  %s2615_s25 = sld [smem:[#allocation9 + %s3142_s29]]  ;;  %v695_v54 = vsub.s32 %v2484_v3, %v691_v46  ;;  %v692_v58 = vmul.u32 16, %v1607_v48  ;;  %v1522_v59 = vadd.s32 4294967295, %v1607_v48  ;;  %v2622_v60 = vmul.f32 %v878_v52, %v2540_v33 }
  0xd8   : > { %761 = vst [vmem:[%s2414_s15 + $0x10] sm:$0xff] %v2582_v39  ;;  %s3140_s26 = sadd.s32 6, %s2410_s16  ;;  %762 = vst [vmem:[%s2414_s15 + $0x18] sm:$0xff] %v2603_v49  ;;  %s2626_s14 = sld [smem:[#allocation9 + %s3141_s7]]  ;;  %vm697_vm8 = vcmp.lt.s32.totalorder %v693_v50, 0  ;;  %vm709_vm9 = vcmp.ge.s32.totalorder %v693_v50, 16  ;;  %v2648_v12 = vmul.f32 %v878_v52, %v2543_v34  ;;  %v2651_v13 = vmul.f32 %v878_v52, %v2582_v39 }
  0xd9   : > { %s852_s11 = sadd.s32 9, %s2410_s16  ;;  %vm698_vm10 = vcmp.lt.s32.totalorder %v694_v51, 0  ;;  %vm710_vm11 = vcmp.ge.s32.totalorder %v694_v51, 16  ;;  %s2631_s3 = sld [smem:[#allocation9 + %s3140_s26]]  ;;  %v705_v61 = vsel %vm697_vm8, %v1519_v43, %v2547_v36  ;;  %vm699_vm12 = vcmp.lt.s32.totalorder %v695_v54, 0  ;;  %v784_v43 = vld [vmem:[%s2374_s4] sm:$0xff] }
  0xda   : > { %s3139_s28 = sadd.s32 8, %s2410_s16  ;;  %v706_v62 = vsel %vm698_vm10, %v1520_v45, %v2549_v37  ;;  %vm711_vm13 = vcmp.ge.s32.totalorder %v695_v54, 16  ;;  %s854_s13 = sadd.s32 10, %s2410_s16  ;;  %v713_v63 = vadd.s32 1, %v705_v61  ;;  %v707_v8 = vsel %vm699_vm12, %v1521_v47, %v1605_v26  ;;  %v1538_v44 = vld [vmem:[%s2374_s4 + $0x20] sm:$0xff] }
  0xdb   : > { %s2638_s12 = sld [smem:[#allocation9 + %s3139_s28]]  ;;  %v714_v7 = vadd.s32 1, %v706_v62  ;;  %v696_v9 = vsub.s32 %v2487_v4, %v692_v58  ;;  %v715_v10 = vadd.s32 1, %v707_v8  ;;  %v2659_v20 = vmul.f32 %v878_v52, %v2603_v49  ;;  %v1542_v45 = vld [vmem:[%s2374_s4 + $0x40] sm:$0xff] }
  0xdc   : > { %s2642_s1 = sld [smem:[#allocation9 + %s852_s11]]  ;;  %v2645_v11 = vstv %s2590_s23  ;;  %v717_v0 = vsel %vm709_vm9, %v713_v63, %v705_v61  ;;  %s1160_s23 = sshll.u32 %s2517_s10, 4  ;;  %v2743_v54 = vmul.f32 %v1538_v44, %v2428_v29  ;;  %v2746_v58 = vmul.f32 %v1542_v45, %v2428_v29  ;;  %s2685_s23 = int_to_ptr.vmem [resolvable:$true] %s1160_s23 }
  0xdd   : > { %v718_v14 = vsel %vm710_vm11, %v714_v7, %v706_v62  ;;  %vm700_vm14 = vcmp.lt.s32.totalorder %v696_v9, 0  ;;  %vm712_vm15 = vcmp.ge.s32.totalorder %v696_v9, 16  ;;  %s2655_s2 = sld [smem:[#allocation9 + %s854_s13]]  ;;  %v721_v1 = vmul.u32 16, %v717_v0  ;;  %s1921_s11 = scalar_lea.vmem %s2685_s23, 1024 }
  0xde   : > { %v722_v15 = vmul.u32 16, %v718_v14  ;;  %v719_v16 = vsel %vm711_vm13, %v715_v10, %v707_v8  ;;  %v708_v17 = vsel %vm700_vm14, %v1522_v59, %v1607_v48  ;;  %v902_v21 = vstv %s2615_s25  ;;  %s1588_s25 = sshll.u32 %s2095_s20, 10  ;;  %p1922_p6 = scmp.ne.s32.totalorder %s2685_s23, %s1921_s11 }
  0xdf   : > { %v723_v18 = vmul.u32 16, %v719_v16  ;;  %v716_v19 = vadd.s32 1, %v708_v17  ;;  %v725_v22 = vsub.s32 %v2464_v56, %v721_v1  ;;  %v2666_v24 = vmul.f32 %v902_v21, %v2540_v33 }
  0xe0   : > { %v726_v23 = vsub.s32 %v2467_v57, %v722_v15  ;;  %v2669_v25 = vstv %s2626_s14  ;;  %v2674_v27 = vstv %s2631_s3  ;;  %v2677_v30 = vmul.f32 %v902_v21, %v2543_v34  ;;  %s2696_s14 = sld [smem:[#allocation10 + %s2410_s16]]  ;;  %p1923_p1 = pnand %p1922_p6, %p3187_p7 }
  0xe1   : > { %v727_v2 = vsub.s32 %v2484_v3, %v723_v18  ;;  %v720_v6 = vsel %vm712_vm15, %v716_v19, %v708_v17  ;;  %v746_v56 = vcvt.s32.f32 %v725_v22  ;;  %1533 = vst [vmem:[%s2517_s10 + $0x20] sm:$0xff] %v725_v22  ;;  %v2683_v3 = vmul.f32 %v902_v21, %v2582_v39  ;;  %s2118_s3 = smov [#allocation19]  }
  0xe2   : > { %v747_v57 = vcvt.s32.f32 %v726_v23  ;;  %1534 = vst [vmem:[%s2517_s10 + $0x28] sm:$0xff] %v726_v23  ;;  %v724_v31 = vmul.u32 16, %v720_v6  ;;  %v2689_v35 = vmul.f32 %v902_v21, %v2603_v49  ;;  %v926_v36 = vstv %s2638_s12  ;;  %s3190_s12 = sld [smem:[#allocation43_spill]]  ;;  %p1924_p8 = pneg %p1923_p1 }
  0xe3   : > { %v748_v32 = vcvt.s32.f32 %v727_v2  ;;  %1535 = vst [vmem:[%s2517_s10 + $0x30] sm:$0xff] %v727_v2  ;;  %v2693_v37 = vstv %s2642_s1  ;;  %v751_v38 = vsub.f32 %v746_v56, %v2426_v28  ;;  %v2702_v42 = vmul.f32 %v926_v36, %v2540_v33  ;;  %s3191_s1 = sadd.s32 1, %s2410_s16 }
  0xe4   : > { %v752_v26 = vsub.f32 %v747_v57, %v2426_v28  ;;  %v728_v41 = vsub.s32 %v2487_v4, %v724_v31  ;;  %v2714_v47 = vstv %s2655_s2  ;;  %v2717_v4 = vmul.f32 %v926_v36, %v2543_v34  ;;  %s2724_s28 = sld [smem:[#allocation10 + %s3191_s1]]  ;;  %s1925_s1 = sshll.u32 %s2118_s3, 4  ;;  %s1926_s1 = int_to_ptr.vmem [resolvable:$false] %s1925_s1 }
  0xe5   : > { %v753_v46 = vsub.f32 %v748_v32, %v2426_v28  ;;  %v2720_v33 = vmul.f32 %v926_v36, %v2582_v39  ;;  %v755_v50 = vmul.f32 %v751_v38, %v2461_v55  ;;  %v2732_v52 = vmul.f32 %v926_v36, %v2603_v49  ;;  %s1927_s26 = scalar_lea.vmem %s1926_s1, 2048  ;;  %p1928_p10 = scmp.lt.s32.totalorder %s2685_s23, %s1926_s1 }
  0xe6   : > { %v749_v48 = vcvt.s32.f32 %v728_v41  ;;  %1536 = vst [vmem:[%s2517_s10 + $0x38] sm:$0xff] %v728_v41  ;;  %v2729_v51 = vmul.f32 %v752_v26, %v2461_v55  ;;  %v2740_v39 = vmul.f32 %v2428_v29, %v784_v43  ;;  %p1929_p9 = scmp.lt.s32.totalorder %s1927_s26, %s1921_s11 }
  0xe7   : > { %v2737_v34 = vmul.f32 %v753_v46, %v2461_v55 }
  0xe8   : > { %s2710_s13 = scalar_lea.hbm %s3190_s12, %s1588_s25  ;;  %p1930_p11 = por %p1929_p9, %p1928_p10 }
  0xea   : > { %p1931_p4 = pnand %p1930_p11, %p1924_p8 }
  0xec   : > { %1934 = shalt.err (!%p1931_p4)
}
  0xed   : > { %s1935_s7 = scalar_lea.hbm %s2710_s13, 1024  ;;  %s1939_s3 = scalar_lea.hbm %s3190_s12, 2048 }
  0xee   : > { %p1936_p2 = scmp.ne.s32.totalorder %s2710_s13, %s1935_s7  ;;  %p1940_p0 = scmp.lt.s32.totalorder %s2710_s13, %s3190_s12 }
  0xef   : > { %p1941_p5 = scmp.lt.s32.totalorder %s1939_s3, %s1935_s7 }
  0xf0   : > { %p1937_p3 = pnand %p1936_p2, %p3187_p7 }
  0xf1   : > { %p1942_p12 = por %p1941_p5, %p1940_p0 }
  0xf2   : > { %p1938_p13 = pneg %p1937_p3 }
  0xf4   : > { %p1943_p6 = pnand %p1942_p12, %p1938_p13 }
  0xf6   : > { %1946 = shalt.err (!%p1943_p6)
}
  0xf7   : > { %s3192_s26 = scalar_lea.sflag [#allocation20], %s2367_s19  ;;  %v754_v49 = vsub.f32 %v749_v48, %v2426_v28  ;;  %1525 = vst [vmem:[%s2414_s15 + $0x20] sm:$0xff] %v755_v50  ;;  %1526 = vst [vmem:[%s2414_s15 + $0x28] sm:$0xff] %v2729_v51  ;;  %v884_v59 = vmul.f32 %v2611_v53, %v755_v50  ;;  %v885_v61 = vmul.f32 %v2611_v53, %v2729_v51  ;;  %s3193_s29 = sadd.s32 2, %s2410_s16 }
  0xf8   : > { %1636 = dma.vmem_to_hbm [thread:$0]  (%p3187_p7), %s2685_s23, 1024, %s2710_s13, %s3192_s26, %s3143_s0, %s3143_s0, %s2117_s27   ;;  %v908_v62 = vmul.f32 %v2669_v25, %v755_v50  ;;  %v886_v28 = vmul.f32 %v2611_v53, %v2737_v34  ;;  %v909_v63 = vmul.f32 %v2669_v25, %v2729_v51  ;;  %v910_v7 = vmul.f32 %v2669_v25, %v2737_v34 }
  0xf9   : > { %1527 = vst [vmem:[%s2414_s15 + $0x30] sm:$0xff] %v2737_v34  ;;  %s2786_s7 = sld [smem:[#allocation10 + %s3193_s29]]  ;;  %v932_v8 = vmul.f32 %v2693_v37, %v755_v50  ;;  %v758_v9 = vmul.f32 %v754_v49, %v2461_v55  ;;  %v888_v10 = vadd.f32 %v884_v59, %v2622_v60  ;;  %v889_v0 = vadd.f32 %v885_v61, %v2648_v12  ;;  %s3194_s23 = smul.u32 1536, %s2095_s20 }
  0xfa   : > { %v912_v14 = vadd.f32 %v908_v62, %v2666_v24  ;;  %s3195_s25 = sld [smem:[#allocation42_spill]]  ;;  %s3196_s11 = sshll.u32 %s2414_s15, 4  ;;  %v890_v55 = vadd.f32 %v886_v28, %v2651_v13  ;;  %v913_v60 = vadd.f32 %v909_v63, %v2677_v30  ;;  %v914_v12 = vadd.f32 %v910_v7, %v2683_v3  ;;  %s2808_s11 = int_to_ptr.vmem [resolvable:$true] %s3196_s11 }
  0xfb   : > { %v936_v1 = vadd.f32 %v932_v8, %v2702_v42  ;;  %1528 = vst [vmem:[%s2414_s15 + $0x38] sm:$0xff] %v758_v9  ;;  %v893_v15 = vadd.f32 %v2645_v11, %v888_v10  ;;  %v894_v16 = vadd.f32 %v2645_v11, %v889_v0  ;;  %v887_v17 = vmul.f32 %v2611_v53, %v758_v9  ;;  %s1947_s1 = scalar_lea.vmem %s2808_s11, 1536  ;;  %s2119_s15 = smov [#allocation18]  }
  0xfc   : > { %v917_v18 = vadd.f32 %v2674_v27, %v912_v14  ;;  %v895_v19 = vadd.f32 %v2645_v11, %v890_v55  ;;  %v918_v13 = vadd.f32 %v2674_v27, %v913_v60  ;;  %v919_v21 = vadd.f32 %v2674_v27, %v914_v12  ;;  %p1948_p1 = scmp.ne.s32.totalorder %s2808_s11, %s1947_s1  ;;  %s1951_s3 = sshll.u32 %s2119_s15, 4  ;;  %s1952_s3 = int_to_ptr.vmem [resolvable:$false] %s1951_s3 }
  0xfd   : > { %v911_v22 = vmul.f32 %v2669_v25, %v758_v9  ;;  %s1953_s26 = scalar_lea.vmem %s1952_s3, 3072  ;;  %p1954_p9 = scmp.lt.s32.totalorder %s2808_s11, %s1952_s3 }
  0xfe   : > { %p1949_p8 = pnand %p1948_p1, %p3187_p7  ;;  %p1955_p11 = scmp.lt.s32.totalorder %s1953_s26, %s1947_s1 }
 0x100   : > { %s2804_s10 = scalar_lea.hbm %s3195_s25, %s3194_s23  ;;  %p1950_p10 = pneg %p1949_p8 }
 0x101   : > { %p1956_p4 = por %p1955_p11, %p1954_p9 }
 0x103   : > { %p1957_p2 = pnand %p1956_p4, %p1950_p10 }
 0x105   : > { %1960 = shalt.err (!%p1957_p2)
}
 0x106   : > { %s1961_s29 = scalar_lea.hbm %s2804_s10, 1536  ;;  %s1965_s2 = scalar_lea.hbm %s3195_s25, 3072 }
 0x107   : > { %p1962_p3 = scmp.ne.s32.totalorder %s2804_s10, %s1961_s29  ;;  %p1966_p5 = scmp.lt.s32.totalorder %s2804_s10, %s3195_s25 }
 0x108   : > { %p1967_p12 = scmp.lt.s32.totalorder %s1965_s2, %s1961_s29 }
 0x109   : > { %p1963_p13 = pnand %p1962_p3, %p3187_p7 }
 0x10a   : > { %p1968_p6 = por %p1967_p12, %p1966_p5 }
 0x10b   : > { %p1964_p0 = pneg %p1963_p13 }
 0x10d   : > { %p1969_p1 = pnand %p1968_p6, %p1964_p0 }
 0x10f   : > { %1972 = shalt.err (!%p1969_p1)
}
 0x110   : > { %s3197_s1 = smov 128   ;;  %s3198_s3 = scalar_lea.sflag [#allocation17], %s2367_s19  ;;  %1554 = vst [vmem:[%s2477_s24 + $0x60] sm:$0xff] %v893_v15  ;;  %1555 = vst [vmem:[%s2477_s24 + $0x68] sm:$0xff] %v894_v16  ;;  %v891_v53 = vadd.f32 %v887_v17, %v2659_v20  ;;  %v941_v23 = vadd.f32 %v2714_v47, %v936_v1  ;;  %v933_v24 = vmul.f32 %v2693_v37, %v2729_v51  ;;  %v2863_v6 = vstv %s2696_s14  ;;  %v785_v56 = vld [vmem:[%s2374_s4 + $0x8] sm:$0xff] }
 0x111   : > { %1635 = dma.vmem_to_hbm [thread:$0]  (%p3187_p7), %s2808_s11, 1536, %s2804_s10, %s3198_s3, %s3197_s1, %s3197_s1, %s2117_s27   ;;  %v934_v25 = vmul.f32 %v2693_v37, %v2737_v34  ;;  %v915_v2 = vadd.f32 %v911_v22, %v2689_v35  ;;  %v935_v20 = vmul.f32 %v2693_v37, %v758_v9  ;;  %v960_v32 = vmul.f32 %v2863_v6, %v2740_v39 }
 0x112   : > { %1558 = vst [vmem:[%s2477_s24 + $0x80] sm:$0xff] %v917_v18  ;;  %1556 = vst [vmem:[%s2477_s24 + $0x70] sm:$0xff] %v895_v19  ;;  %v2866_v30 = vstv %s2724_s28  ;;  %s1610_s0 = smul.u32 3072, %s2095_s20  ;;  %v896_v57 = vadd.f32 %v2645_v11, %v891_v53  ;;  %v937_v31 = vadd.f32 %v933_v24, %v2717_v4  ;;  %v1539_v35 = vld [vmem:[%s2374_s4 + $0x28] sm:$0xff]  ;;  %s3199_s28 = sadd.s32 4, %s2410_s16  ;;  %v2899_v46 = vmul.f32 %v2428_v29, %v785_v56 }
 0x113   : > { %1559 = vst [vmem:[%s2477_s24 + $0x88] sm:$0xff] %v918_v13  ;;  %1560 = vst [vmem:[%s2477_s24 + $0x90] sm:$0xff] %v919_v21  ;;  %v938_v3 = vadd.f32 %v934_v25, %v2720_v33  ;;  %v1543_v36 = vld [vmem:[%s2374_s4 + $0x48] sm:$0xff]  ;;  %s2880_s14 = sld [smem:[#allocation10 + %s3199_s28]]  ;;  %s1178_s10 = sshll.u32 %s2477_s24, 4  ;;  %v920_v11 = vadd.f32 %v2674_v27, %v915_v2  ;;  %v939_v37 = vadd.f32 %v935_v20, %v2732_v52  ;;  %v2888_v26 = vstv %s2786_s7  ;;  %s2922_s10 = int_to_ptr.vmem [resolvable:$true] %s1178_s10 }
 0x114   : > { %1562 = vst [vmem:[%s2477_s24 + $0xa0] sm:$0xff] %v941_v23  ;;  %v965_v38 = vmul.f32 %v2866_v30, %v2743_v54  ;;  %v786_v41 = vld [vmem:[%s2374_s4 + $0x10] sm:$0xff]  ;;  %1557 = vst [vmem:[%s2477_s24 + $0x78] sm:$0xff] %v896_v57  ;;  %v942_v44 = vadd.f32 %v2714_v47, %v937_v31  ;;  %v974_v27 = vmul.f32 %v2888_v26, %v2746_v58  ;;  %v787_v4 = vld [vmem:[%s2374_s4 + $0x18] sm:$0xff]  ;;  %s3200_s7 = sadd.s32 5, %s2410_s16  ;;  %s3201_s23 = sld [smem:[#allocation44_spill]] }
 0x115   : > { %v1540_v42 = vld [vmem:[%s2374_s4 + $0x30] sm:$0xff]  ;;  %v943_v45 = vadd.f32 %v2714_v47, %v938_v3  ;;  %s2904_s11 = sld [smem:[#allocation10 + %s3200_s7]]  ;;  %1561 = vst [vmem:[%s2477_s24 + $0x98] sm:$0xff] %v920_v11  ;;  %v944_v33 = vadd.f32 %v2714_v47, %v939_v37  ;;  %v2909_v50 = vmul.f32 %v1539_v35, %v2428_v29  ;;  %v2912_v51 = vmul.f32 %v1543_v36, %v2428_v29  ;;  %v1541_v52 = vld [vmem:[%s2374_s4 + $0x38] sm:$0xff] }
 0x116   : > { %v1544_v43 = vld [vmem:[%s2374_s4 + $0x50] sm:$0xff]  ;;  %v969_v48 = vadd.f32 %v965_v38, %v960_v32  ;;  %1563 = vst [vmem:[%s2477_s24 + $0xa8] sm:$0xff] %v942_v44  ;;  %v961_v47 = vmul.f32 %v2863_v6, %v2899_v46  ;;  %v2929_v34 = vmul.f32 %v2428_v29, %v786_v41  ;;  %v2932_v49 = vmul.f32 %v1540_v42, %v2428_v29  ;;  %v1545_v61 = vld [vmem:[%s2374_s4 + $0x58] sm:$0xff]  ;;  %s1973_s4 = scalar_lea.vmem %s2922_s10, 3072 }
 0x117   : > { %1564 = vst [vmem:[%s2477_s24 + $0xb0] sm:$0xff] %v943_v45  ;;  %v2935_v59 = vmul.f32 %v1544_v43, %v2428_v29  ;;  %1565 = vst [vmem:[%s2477_s24 + $0xb8] sm:$0xff] %v944_v33  ;;  %v966_v28 = vmul.f32 %v2866_v30, %v2909_v50  ;;  %v975_v63 = vmul.f32 %v2888_v26, %v2912_v51  ;;  %p1974_p8 = scmp.ne.s32.totalorder %s2922_s10, %s1973_s4  ;;  %s2120_s24 = smov [#allocation21]  }
 0x118   : > { %v978_v62 = vadd.f32 %v974_v27, %v969_v48  ;;  %v2944_v7 = vmul.f32 %v2428_v29, %v787_v4  ;;  %v962_v8 = vmul.f32 %v2863_v6, %v2929_v34  ;;  %v967_v9 = vmul.f32 %v2866_v30, %v2932_v49  ;;  %s1977_s2 = sshll.u32 %s2120_s24, 4  ;;  %s1978_s2 = int_to_ptr.vmem [resolvable:$false] %s1977_s2 }
 0x119   : > { %v976_v10 = vmul.f32 %v2888_v26, %v2935_v59  ;;  %v2953_v0 = vmul.f32 %v1541_v52, %v2428_v29  ;;  %p1975_p10 = pnand %p1974_p8, %p3187_p7  ;;  %s1979_s15 = scalar_lea.vmem %s1978_s2, 6144 }
 0x11a   : > { %s2920_s13 = scalar_lea.hbm %s3201_s23, %s1610_s0  ;;  %p1980_p11 = scmp.lt.s32.totalorder %s2922_s10, %s1978_s2 }
 0x11b   : > { %p1976_p9 = pneg %p1975_p10  ;;  %p1981_p4 = scmp.lt.s32.totalorder %s1979_s15, %s1973_s4 }
 0x11d   : > { %p1982_p2 = por %p1981_p4, %p1980_p11 }
 0x11f   : > { %p1983_p3 = pnand %p1982_p2, %p1976_p9 }
 0x121   : > { %1986 = shalt.err (!%p1983_p3)
}
 0x122   : > { %s1987_s3 = scalar_lea.hbm %s2920_s13, 3072  ;;  %s1991_s7 = scalar_lea.hbm %s3201_s23, 6144 }
 0x123   : > { %p1988_p13 = scmp.ne.s32.totalorder %s2920_s13, %s1987_s3  ;;  %p1992_p12 = scmp.lt.s32.totalorder %s2920_s13, %s3201_s23 }
 0x124   : > { %p1993_p6 = scmp.lt.s32.totalorder %s1991_s7, %s1987_s3 }
 0x125   : > { %p1989_p0 = pnand %p1988_p13, %p3187_p7 }
 0x126   : > { %p1994_p1 = por %p1993_p6, %p1992_p12 }
 0x127   : > { %p1990_p5 = pneg %p1989_p0 }
 0x129   : > { %p1995_p8 = pnand %p1994_p1, %p1990_p5 }
 0x12b   : > { %1998 = shalt.err (!%p1995_p8)
}
 0x12c   : > { %s3202_s4 = scalar_lea.sflag [#allocation20], %s2367_s19  ;;  %v982_v14 = vmax.f32 %v978_v62, 0.0  ;;  %v970_v55 = vadd.f32 %v966_v28, %v961_v47  ;;  %v2981_v60 = vmul.f32 %v1545_v61, %v2428_v29  ;;  %v963_v12 = vmul.f32 %v2863_v6, %v2944_v7  ;;  %s3203_s24 = sadd.s32 6, %s2410_s16 }
 0x12d   : > { %1637 = dma.vmem_to_hbm [thread:$0]  (%p3187_p7), %s2922_s10, 3072, %s2920_s13, %s3202_s4, %s3197_s1, %s3197_s1, %s2117_s27   ;;  %v971_v1 = vadd.f32 %v967_v9, %v962_v8  ;;  %v968_v15 = vmul.f32 %v2866_v30, %v2953_v0  ;;  %v995_v16 = vmul.f32 %v2491_v5, %v2740_v39  ;;  %v996_v23 = vmul.f32 %v2491_v5, %v2899_v46 }
 0x12e   : > { %s2987_s2 = sld [smem:[#allocation10 + %s3203_s24]]  ;;  %v999_v17 = vstv %s2880_s14  ;;  %v986_v18 = vmin.f32 %v982_v14, 1.0  ;;  %v979_v19 = vadd.f32 %v975_v63, %v970_v55  ;;  %v977_v29 = vmul.f32 %v2888_v26, %v2981_v60  ;;  %s3204_s19 = sadd.s32 8, %s2410_s16 }
 0x12f   : > { %v1000_v13 = vmul.f32 %v999_v17, %v2743_v54  ;;  %v980_v21 = vadd.f32 %v976_v10, %v971_v1  ;;  %v972_v22 = vadd.f32 %v968_v15, %v963_v12  ;;  %v1008_v53 = vstv %s2904_s11  ;;  %s3002_s10 = sld [smem:[#allocation10 + %s3204_s19]]  ;;  %s3005_s13 = scalar_lea.vmem [#allocation15], %s2370_s30 }
 0x130   : > { %990 = vst [vmem:[%s3005_s13] sm:$0xff] %v986_v18  ;;  %v983_v24 = vmax.f32 %v979_v19, 0.0  ;;  %v1009_v2 = vmul.f32 %v1008_v53, %v2746_v58  ;;  %v1001_v20 = vmul.f32 %v999_v17, %v2909_v50  ;;  %v1010_v56 = vmul.f32 %v1008_v53, %v2912_v51  ;;  %s1106_s30 = sshll.u32 %s3005_s13, 4  ;;  %s3205_s16 = smul.u32 1536, %s2095_s20  ;;  %s3054_s30 = int_to_ptr.vmem [resolvable:$true] %s1106_s30 }
 0x131   : > { %v1004_v25 = vadd.f32 %v1000_v13, %v995_v16  ;;  %v984_v6 = vmax.f32 %v980_v21, 0.0  ;;  %v981_v30 = vadd.f32 %v977_v29, %v972_v22  ;;  %v997_v57 = vmul.f32 %v2491_v5, %v2929_v34  ;;  %s3206_s15 = sld [smem:[#allocation41_spill]]  ;;  %s1071_s0 = scalar_lea.sflag [#allocation4], %s2355_s9 }
 0x132   : > { %v987_v31 = vmin.f32 %v983_v24, 1.0  ;;  %v1005_v32 = vadd.f32 %v1001_v20, %v996_v23  ;;  %v1002_v35 = vmul.f32 %v999_v17, %v2932_v49  ;;  %v1011_v37 = vmul.f32 %v1008_v53, %v2935_v59  ;;  %s1999_s28 = scalar_lea.vmem %s3054_s30, 1536  ;;  %s2121_s7 = smov [#allocation15]  }
 0x133   : > { %v1013_v3 = vadd.f32 %v1009_v2, %v1004_v25  ;;  %v988_v36 = vmin.f32 %v984_v6, 1.0  ;;  %v985_v11 = vmax.f32 %v981_v30, 0.0  ;;  %v998_v38 = vmul.f32 %v2491_v5, %v2944_v7  ;;  %p2000_p10 = scmp.ne.s32.totalorder %s3054_s30, %s1999_s28  ;;  %s2003_s20 = sshll.u32 %s2121_s7, 4  ;;  %s2004_s20 = int_to_ptr.vmem [resolvable:$false] %s2003_s20 }
 0x134   : > { %991 = vst [vmem:[%s3005_s13 + $0x8] sm:$0xff] %v987_v31  ;;  %v1014_v41 = vadd.f32 %v1010_v56, %v1005_v32  ;;  %v1006_v42 = vadd.f32 %v1002_v35, %v997_v57  ;;  %v1003_v43 = vmul.f32 %v999_v17, %v2953_v0  ;;  %v1012_v45 = vmul.f32 %v1008_v53, %v2981_v60  ;;  %s2005_s26 = scalar_lea.vmem %s2004_s20, 3072  ;;  %p2006_p4 = scmp.lt.s32.totalorder %s3054_s30, %s2004_s20 }
 0x135   : > { %v1017_v26 = vmax.f32 %v1013_v3, 0.0  ;;  %992 = vst [vmem:[%s3005_s13 + $0x10] sm:$0xff] %v988_v36  ;;  %v989_v44 = vmin.f32 %v985_v11, 1.0  ;;  %v1030_v27 = vstv %s2987_s2  ;;  %v1036_v4 = vmul.f32 %v2585_v40, %v2743_v54  ;;  %p2001_p9 = pnand %p2000_p10, %p3187_p7  ;;  %p2007_p2 = scmp.lt.s32.totalorder %s2005_s26, %s1999_s28 }
 0x136   : > { %v1018_v48 = vmax.f32 %v1014_v41, 0.0  ;;  %v1015_v52 = vadd.f32 %v1011_v37, %v1006_v42  ;;  %v1007_v5 = vadd.f32 %v1003_v43, %v998_v38  ;;  %v1031_v47 = vmul.f32 %v1030_v27, %v2740_v39 }
 0x137   : > { %v1021_v33 = vmin.f32 %v1017_v26, 1.0  ;;  %993 = vst [vmem:[%s3005_s13 + $0x18] sm:$0xff] %v989_v44  ;;  %v1044_v61 = vstv %s3002_s10  ;;  %v1032_v62 = vmul.f32 %v1030_v27, %v2899_v46  ;;  %v1037_v28 = vmul.f32 %v2585_v40, %v2909_v50  ;;  %s3052_s3 = scalar_lea.hbm %s3206_s15, %s3205_s16  ;;  %p2002_p11 = pneg %p2001_p9 }
 0x138   : > { %v1022_v63 = vmin.f32 %v1018_v48, 1.0  ;;  %v1019_v8 = vmax.f32 %v1015_v52, 0.0  ;;  %v1016_v9 = vadd.f32 %v1012_v45, %v1007_v5  ;;  %v1045_v54 = vmul.f32 %v1044_v61, %v2746_v58  ;;  %p2008_p3 = por %p2007_p2, %p2006_p4 }
 0x139   : > { %1566 = vst [vmem:[%s3005_s13 + $0x20] sm:$0xff] %v1021_v33  ;;  %v1040_v10 = vadd.f32 %v1036_v4, %v1031_v47  ;;  %v1041_v14 = vadd.f32 %v1037_v28, %v1032_v62  ;;  %v1046_v55 = vmul.f32 %v1044_v61, %v2912_v51  ;;  %v1033_v12 = vmul.f32 %v1030_v27, %v2929_v34 }
 0x13a   : > { %1567 = vst [vmem:[%s3005_s13 + $0x28] sm:$0xff] %v1022_v63  ;;  %v1023_v39 = vmin.f32 %v1019_v8, 1.0  ;;  %v1020_v46 = vmax.f32 %v1016_v9, 0.0  ;;  %v1038_v50 = vmul.f32 %v2585_v40, %v2932_v49  ;;  %v1047_v1 = vmul.f32 %v1044_v61, %v2935_v59  ;;  %p2009_p13 = pnand %p2008_p3, %p2002_p11 }
 0x13b   : > { %v1049_v15 = vadd.f32 %v1045_v54, %v1040_v10  ;;  %v1050_v16 = vadd.f32 %v1046_v55, %v1041_v14  ;;  %v1034_v58 = vmul.f32 %v1030_v27, %v2944_v7  ;;  %v1039_v51 = vmul.f32 %v2585_v40, %v2953_v0 }
 0x13c   : > { %1568 = vst [vmem:[%s3005_s13 + $0x30] sm:$0xff] %v1023_v39  ;;  %v1024_v34 = vmin.f32 %v1020_v46, 1.0  ;;  %v1042_v17 = vadd.f32 %v1038_v50, %v1033_v12  ;;  %v1048_v18 = vmul.f32 %v1044_v61, %v2981_v60 }
 0x13d   : > { %v1053_v19 = vmax.f32 %v1049_v15, 0.0  ;;  %v1054_v49 = vmax.f32 %v1050_v16, 0.0  ;;  %v1043_v59 = vadd.f32 %v1039_v51, %v1034_v58 }
 0x13e   : > { %1569 = vst [vmem:[%s3005_s13 + $0x38] sm:$0xff] %v1024_v34  ;;  %v1051_v29 = vadd.f32 %v1047_v1, %v1042_v17 }
 0x13f   : > { %v1057_v7 = vmin.f32 %v1053_v19, 1.0  ;;  %v1058_v13 = vmin.f32 %v1054_v49, 1.0  ;;  %v1052_v21 = vadd.f32 %v1048_v18, %v1043_v59 }
 0x140   : > { %v1055_v40 = vmax.f32 %v1051_v29, 0.0 }
 0x141   : > { %1570 = vst [vmem:[%s3005_s13 + $0x40] sm:$0xff] %v1057_v7  ;;  %1571 = vst [vmem:[%s3005_s13 + $0x48] sm:$0xff] %v1058_v13  ;;  %v1056_v0 = vmax.f32 %v1052_v21, 0.0 }
 0x142   : > { %v1059_v22 = vmin.f32 %v1055_v40, 1.0 }
 0x143   : > { %v1060_v60 = vmin.f32 %v1056_v0, 1.0 }
 0x144   : > { %1572 = vst [vmem:[%s3005_s13 + $0x50] sm:$0xff] %v1059_v22 }
 0x145   : > { %1573 = vst [vmem:[%s3005_s13 + $0x58] sm:$0xff] %v1060_v60 }
 0x146   : > { %2012 = shalt.err (!%p2009_p13)
}
 0x147   : > { %s2013_s29 = scalar_lea.hbm %s3052_s3, 1536  ;;  %s2017_s24 = scalar_lea.hbm %s3206_s15, 3072 }
 0x148   : > { %p2014_p0 = scmp.ne.s32.totalorder %s3052_s3, %s2013_s29  ;;  %p2018_p6 = scmp.lt.s32.totalorder %s3052_s3, %s3206_s15 }
 0x149   : > { %p2019_p1 = scmp.lt.s32.totalorder %s2017_s24, %s2013_s29 }
 0x14a   : > { %p2015_p5 = pnand %p2014_p0, %p3187_p7 }
 0x14b   : > { %p2020_p8 = por %p2019_p1, %p2018_p6 }
 0x14c   : > { %p2016_p12 = pneg %p2015_p5 }
 0x14e   : > { %p2021_p10 = pnand %p2020_p8, %p2016_p12 }
 0x150   : > { %2024 = shalt.err (!%p2021_p10)
}
 0x151   : > { %1633 = dma.vmem_to_hbm [thread:$0]  (%p3187_p7), %s3054_s30, 1536, %s3052_s3, %s1071_s0, %s3197_s1, %s3197_s1, %s2117_s27  }
 0x152 PF: > { %s3207_s10 = sld [smem:[#allocation30_spill]]  ;;  %p3210_p11 = scmp.ge.s32.totalorder %s2103_s22, 2 }
 0x153   : > { %s3208_s13 = sld [smem:[#allocation32_spill]] }
 0x158   : > { %s1193_s16 = sand.u32 1, %s3207_s10  }
 0x159   : > { %p3209_p9 = scmp.ne.s32.totalorder %s3208_s13, 0  ;;  %s1194_s14 = scalar_lea.sflag [#allocation4], %s1193_s16 }
 0x15b   : > { %p1667_p4 = pnand %p3210_p11, %p3209_p9 }
 0x15d   : > { %p1668_p2 = pneg %p1667_p4 }
 0x15f   : > { %2070 = dma.done.wait (%p1668_p2), %s1194_s14, 1536  }
 0x160   : > { %2072 = vsyncadd (%p1668_p2), %s1194_s14, 4294965760  ;;  %s3211_s17 = sadd.s32 4294967294, %s2103_s22  }
 0x161   : > { %s1202_s11 = sand.u32 1, %s3211_s17  }
 0x162   : > { %s1203_s28 = scalar_lea.sflag [#allocation17], %s1202_s11 }
 0x163   : > { %2074 = dma.done.wait (%p1668_p2), %s1203_s28, 2048  }
 0x164   : > { %2076 = vsyncadd (%p1668_p2), %s1203_s28, 4294965248  ;;  %s1221_s7 = scalar_lea.sflag [#allocation20], %s1202_s11 }
 0x165   : > { %2078 = dma.done.wait (%p1668_p2), %s1221_s7, 4096  }
 0x166   : > { %2080 = vsyncadd (%p1668_p2), %s1221_s7, 4294963200  ;;  %s40_s22 = sadd.s32 1, %s2103_s22   ;;  %s3212_s27 = sld [smem:[#allocation31_spill]] }
 0x167   : > { %p37_p7 = scmp.ge.s32.totalorder %s40_s22, 4   ;;  %s3213_s19 = sld [smem:[#allocation35_spill]] }
 0x168   : > { %s3214_s1 = sld [smem:[#allocation33_spill]]  ;;  %s3215_s17 = smov %s2087_s18 }
 0x169   : > { %s3217_s20 = smov %s2099_s21 }
 0x16a   :  { %39 = sbr.rel (!%p37_p7) target bundleno = 25 (0x19), region = 210 }
 0x16c   : > { %s3216_s18 = smov %s3212_s27 }
 0x16e   : > { %s3218_s21 = smov %s3214_s1 }
 0x16f   :  { %1235 = vsyncpa [#allocation3], 1 }
 0x170   :  { %1237 = vsyncpa [#allocation3 + $0x1], 1 }
 0x171   :  { %1238 = vsyncpa [#allocation7], 1 }
 0x172   :  { %1240 = vsyncpa [#allocation7 + $0x1], 1 }
 0x173   :  { %1241 = vsyncpa [#allocation4], 1 }
 0x174   :  { %1243 = vsyncpa [#allocation4 + $0x1], 1 }
 0x175   :  { %1244 = vsyncpa [#allocation17], 1 }
 0x176   :  { %1246 = vsyncpa [#allocation17 + $0x1], 1 }
 0x177   :  { %1247 = vsyncpa [#allocation20], 1 }
 0x178   :  { %1249 = vsyncpa [#allocation20 + $0x1], 1 }
 0x179   :  { %1250 = vsyncpa [#allocation5], 1 }
 0x17a   :  { %1252 = vsyncpa [#allocation5 + $0x1], 1 }
 0x17b   :  { %1253 = vsyncpa [#allocation11], 1 }
 0x17c   :  { %1254 = vsyncpa [#allocation14], 1 }

</bundles_post_ra>
